<compile_context>
chip_gen: v7x
topology: tpu7x:2x2x1
jax: 0.10.0
libtpu: 0.0.40
codegen_flags: <defaults>
</compile_context>

<pallas_src>
import functools

import jax
import jax.numpy as jnp
from jax import lax
from jax.experimental import pallas as pl
from jax.experimental.pallas import tpu as pltpu


# ----------------------------------------------------------------------------
# Fused Pallas kernel: embedding + all layers + classifier head, one sequence
# per grid step (grid = batch).
# ----------------------------------------------------------------------------
def _fused_forward_kernel(idx_ref, emb_ref, pos_ref,
                          wqk_ref, bqk_ref, wo_ref, bo_ref,
                          w1_ref, b1_ref, w2_ref, b2_ref,
                          wfc_ref, bfc_ref,
                          out_ref, attn_ref, *, d_internal):
    """One full Transformer forward for the sequence at grid position b.

    idx_ref: [1, 1, S]  int32 token indices for this sequence
    emb_ref: [V, D]     token embedding table (VMEM-resident across the grid)
    pos_ref: [S, D]     positional embeddings
    wqk_ref: [L, D, 2*Di]  fused query/key projection ; bqk_ref: [L, 1, 2*Di]
    wo_ref:  [L, Di, D]    attention output projection ; bo_ref: [L, 1, D]
    w1_ref:  [L, D, Di]    FFN layer 1                 ; b1_ref: [L, 1, Di]
    w2_ref:  [L, Di, D]    FFN layer 2                 ; b2_ref: [L, 1, D]
    wfc_ref: [D, C]        classifier head             ; bfc_ref:[1, C]
    out_ref: [1, S, C]     log-softmax probabilities
    attn_ref:[1, L, S, S]  per-layer attention maps
    """
    V, D = emb_ref.shape
    S = pos_ref.shape[0]
    L = wqk_ref.shape[0]
    Di = d_internal
    scale = 1.0 / (float(d_internal) ** 0.5)          # baked-in Python constant

    # ---- Embedding gather fused into the kernel: one-hot matmul on the MXU ---
    idx = idx_ref[0]                                            # [1, S] int32
    vocab_iota = lax.broadcasted_iota(jnp.int32, (V, S), 0)     # [V, S]
    one_hot_t = (vocab_iota == idx).astype(jnp.float32)         # [V, S]
    # Contract the vocab dim of both operands -> [S, D]; exact row select.
    x = lax.dot_general(one_hot_t, emb_ref[...],
                        dimension_numbers=(((0,), (0,)), ((), ())),
                        preferred_element_type=jnp.float32) + pos_ref[...]

    # num_layers is a static (trace-time) constant -> fully unrolled loop.
    # (Fine at small L; at large L switch to a layer grid axis / fori_loop.)
    for l in range(L):
        # Fused Q/K projection: one MXU push instead of two narrow ones.
        qk = jnp.dot(x, wqk_ref[l],
                     preferred_element_type=jnp.float32) + bqk_ref[l]  # [S, 2Di]
        # Fold the 1/sqrt(dk) scale into q ([S,Di]) rather than scores ([S,S]).
        q = qk[:, :Di] * scale                                          # [S, Di]
        k = qk[:, Di:]                                                  # [S, Di]
        v = k  # reference forward uses key_linear for the values as well

        # scores = q @ k.T without materializing the transpose.
        scores = lax.dot_general(
            q, k,
            dimension_numbers=(((1,), (1,)), ((), ())),
            preferred_element_type=jnp.float32)                         # [S, S]

        # Numerically stable, EXACT softmax (matches F.softmax).
        m = jnp.max(scores, axis=-1, keepdims=True)
        e = jnp.exp(scores - m)
        attn = e / jnp.sum(e, axis=-1, keepdims=True)                   # [S, S]
        attn_ref[0, l] = attn

        z = jnp.dot(attn, v, preferred_element_type=jnp.float32)        # [S, Di]
        attn_out = jnp.dot(z, wo_ref[l],
                           preferred_element_type=jnp.float32) + bo_ref[l]  # [S, D]
        resid = x + attn_out

        h = jnp.dot(resid, w1_ref[l],
                    preferred_element_type=jnp.float32) + b1_ref[l]     # [S, Di]
        h = jnp.maximum(h, 0.0)                                         # ReLU
        ff = jnp.dot(h, w2_ref[l],
                     preferred_element_type=jnp.float32) + b2_ref[l]    # [S, D]
        x = ff + resid

    # Classifier head + log_softmax (exact, max-subtracted).
    logits = jnp.dot(x, wfc_ref[...],
                     preferred_element_type=jnp.float32) + bfc_ref[...]  # [S, C]
    m = jnp.max(logits, axis=-1, keepdims=True)
    lse = jnp.log(jnp.sum(jnp.exp(logits - m), axis=-1, keepdims=True)) + m
    out_ref[0] = logits - lse


# ----------------------------------------------------------------------------
# pallas_call wrapper: grid over the batch, weights resident across the grid
# ----------------------------------------------------------------------------
def transformer_forward(params, indices, *, d_internal):
    """indices: [B, S] int32 -> (log_probs [B, S, C], attention_maps [B, L, S, S])."""
    B, S = indices.shape
    emb = params["embedding"]
    pos = params["pos_embedding"][:S]
    wqk, bqk = params["wqk"], params["bqk"]
    wo, bo = params["wo"], params["bo"]
    w1, b1 = params["w1"], params["b1"]
    w2, b2 = params["w2"], params["b2"]
    wfc, bfc = params["fc"]
    V, D = emb.shape
    L = wqk.shape[0]
    Di = d_internal
    C = wfc.shape[1]

    # [B, 1, S] so the last two block dims equal the full array dims.
    idx3 = indices.reshape(B, 1, S).astype(jnp.int32)

    def full(a):
        # Whole-array block, constant block index across the grid -> the array
        # stays resident in VMEM for the entire call (no re-DMA per grid step).
        return pl.BlockSpec(a.shape, lambda b, _nd=a.ndim: (0,) * _nd)

    # Advisory cost estimate so XLA schedules surrounding ops sensibly.
    per_layer_flops = (2 * S * D * (2 * Di)    # fused q/k projection
                       + 2 * S * S * Di        # q @ k.T
                       + 2 * S * S * Di        # attn @ v
                       + 2 * S * Di * D        # output projection
                       + 2 * S * D * Di        # FFN 1
                       + 2 * S * Di * D)       # FFN 2
    flops = B * (2 * S * V * D + L * per_layer_flops + 2 * S * D * C)
    transcendentals = B * (L * S * S + S * C)
    weights = (wqk, bqk, wo, bo, w1, b1, w2, b2, wfc, bfc)
    bytes_accessed = (idx3.size * 4 + emb.size * 4 + pos.size * 4
                      + sum(int(w.size) * 4 for w in weights)
                      + B * S * C * 4 + B * L * S * S * 4)

    kernel = functools.partial(_fused_forward_kernel, d_internal=d_internal)
    log_probs, attn_maps = pl.pallas_call(
        kernel,
        grid_spec=pltpu.PrefetchScalarGridSpec(
            num_scalar_prefetch=0,
            grid=(B,),
            in_specs=[
                pl.BlockSpec((1, 1, S), lambda b: (b, 0, 0)),   # token indices
                full(emb), full(pos),
                full(wqk), full(bqk), full(wo), full(bo),
                full(w1), full(b1), full(w2), full(b2),
                full(wfc), full(bfc),
            ],
            out_specs=(
                pl.BlockSpec((1, S, C), lambda b: (b, 0, 0)),
                pl.BlockSpec((1, L, S, S), lambda b: (b, 0, 0, 0)),
            ),
        ),
        out_shape=(jax.ShapeDtypeStruct((B, S, C), jnp.float32),
                   jax.ShapeDtypeStruct((B, L, S, S), jnp.float32)),
        compiler_params=pltpu.CompilerParams(
            dimension_semantics=("parallel",)),   # shards batch over v7x's 2 TCs
        cost_estimate=pl.CostEstimate(flops=flops,
                                      transcendentals=transcendentals,
                                      bytes_accessed=bytes_accessed),
    )(idx3, emb, pos, wqk, bqk, wo, bo, w1, b1, w2, b2, wfc, bfc)
    return log_probs, attn_maps


# ----------------------------------------------------------------------------
# Parameter construction (deterministic, in-script)
# ----------------------------------------------------------------------------
def init_params(key, vocab_size, num_positions, d_model, d_internal, num_classes,
                num_layers):
    keys = iter(jax.random.split(key, 4 + 10 * num_layers))

    def linear(in_f, out_f):
        # Stored as [in_f, out_f] (transposed vs. PyTorch) and bias [1, out_f].
        w = jax.random.normal(next(keys), (in_f, out_f), jnp.float32) * 0.05
        b = jax.random.normal(next(keys), (1, out_f), jnp.float32) * 0.05
        return w, b

    embedding = jax.random.normal(next(keys), (vocab_size, d_model),
                                  jnp.float32) * 0.1
    pos_embedding = jax.random.normal(next(keys), (num_positions, d_model),
                                      jnp.float32) * 0.1

    wqk_l, bqk_l, wo_l, bo_l, w1_l, b1_l, w2_l, b2_l = ([] for _ in range(8))
    for _ in range(num_layers):
        wq, bq = linear(d_model, d_internal)
        wk, bk = linear(d_model, d_internal)
        # value_linear exists in the module but is unused in forward; omitted.
        wo, bo = linear(d_internal, d_model)
        w1, b1 = linear(d_model, d_internal)
        w2, b2 = linear(d_internal, d_model)
        wqk_l.append(jnp.concatenate([wq, wk], axis=1))    # [D, 2*Di]
        bqk_l.append(jnp.concatenate([bq, bk], axis=1))    # [1, 2*Di]
        wo_l.append(wo); bo_l.append(bo)
        w1_l.append(w1); b1_l.append(b1)
        w2_l.append(w2); b2_l.append(b2)

    return {
        "embedding": embedding,
        "pos_embedding": pos_embedding,
        "wqk": jnp.stack(wqk_l), "bqk": jnp.stack(bqk_l),
        "wo": jnp.stack(wo_l), "bo": jnp.stack(bo_l),
        "w1": jnp.stack(w1_l), "b1": jnp.stack(b1_l),
        "w2": jnp.stack(w2_l), "b2": jnp.stack(b2_l),
        "fc": linear(d_model, num_classes),
    }


# ----------------------------------------------------------------------------
# Pure-JAX reference (same quirky semantics) for validation — single sequence
# ----------------------------------------------------------------------------
def reference_forward(params, indices, d_internal):
    S = indices.shape[0]
    x = params["embedding"][indices] + params["pos_embedding"][:S]
    attns = []
    L = params["wqk"].shape[0]
    for l in range(L):
        qk = x @ params["wqk"][l] + params["bqk"][l]
        q, k = qk[:, :d_internal], qk[:, d_internal:]
        v = k
        scores = (q @ k.T) / jnp.sqrt(jnp.float32(d_internal))
        attn = jax.nn.softmax(scores, axis=-1)
        attns.append(attn)
        resid = x + attn @ v @ params["wo"][l] + params["bo"][l]
        h = jax.nn.relu(resid @ params["w1"][l] + params["b1"][l])
        x = h @ params["w2"][l] + params["b2"][l] + resid
    wfc, bfc = params["fc"]
    logits = x @ wfc + bfc
    return jax.nn.log_softmax(logits, axis=-1), jnp.stack(attns)


# ----------------------------------------------------------------------------
# Main
# ----------------------------------------------------------------------------
if __name__ == "__main__":
    vocab_size = 27
    num_positions = 20
    d_model = 32
    d_internal = 16
    num_classes = 3
    num_layers = 2
    seq_len = 20
    batch = 8

    key = jax.random.PRNGKey(0)
    pkey, ikey = jax.random.split(key)

    params = init_params(pkey, vocab_size, num_positions, d_model, d_internal,
                         num_classes, num_layers)
    indices = jax.random.randint(ikey, (batch, seq_len), 0, vocab_size,
                                 dtype=jnp.int32)

    fwd = jax.jit(functools.partial(transformer_forward, d_internal=d_internal))
    log_probs, attn_maps = fwd(params, indices)
    log_probs = jax.block_until_ready(log_probs)
    attn_maps = jax.block_until_ready(attn_maps)

    assert log_probs.shape == (batch, seq_len, num_classes)
    assert attn_maps.shape == (batch, num_layers, seq_len, seq_len)

    # Sanity: probabilities sum to 1 (exact softmax now, tight tolerance).
    assert jnp.allclose(jnp.exp(log_probs).sum(-1), 1.0, atol=1e-5)
    assert jnp.allclose(attn_maps.sum(-1), 1.0, atol=1e-5)

    # Full numerical check against a pure-JAX reference of the same semantics.
    ref_lp, ref_attn = jax.vmap(
        lambda idx: reference_forward(params, idx, d_internal))(indices)
    assert jnp.allclose(log_probs, ref_lp, atol=1e-4, rtol=1e-4)
    assert jnp.allclose(attn_maps, ref_attn, atol=1e-4, rtol=1e-4)

    print("KERNEL_OK")
</pallas_src>

<mosaic_0001>
module attributes {stable_mosaic.version = 11 : i64} {
  func.func @_fused_forward_kernel(%arg0: i32, %arg1: memref<1x1x20xi32, #tpu.memory_space<vmem>>, %arg2: memref<27x32xf32, #tpu.memory_space<vmem>>, %arg3: memref<20x32xf32, #tpu.memory_space<vmem>>, %arg4: memref<2x32x32xf32, #tpu.memory_space<vmem>>, %arg5: memref<2x1x32xf32, #tpu.memory_space<vmem>>, %arg6: memref<2x16x32xf32, #tpu.memory_space<vmem>>, %arg7: memref<2x1x32xf32, #tpu.memory_space<vmem>>, %arg8: memref<2x32x16xf32, #tpu.memory_space<vmem>>, %arg9: memref<2x1x16xf32, #tpu.memory_space<vmem>>, %arg10: memref<2x16x32xf32, #tpu.memory_space<vmem>>, %arg11: memref<2x1x32xf32, #tpu.memory_space<vmem>>, %arg12: memref<32x3xf32, #tpu.memory_space<vmem>>, %arg13: memref<1x3xf32, #tpu.memory_space<vmem>>, %arg14: memref<1x20x3xf32, #tpu.memory_space<vmem>>, %arg15: memref<1x2x20x20xf32, #tpu.memory_space<vmem>>) attributes {dimension_semantics = [#tpu.dimension_semantics<parallel>], iteration_bounds = array<i64: 8>, scalar_prefetch = 0 : i64, scratch_operands = 0 : i64, tpu.core_type = #tpu.core_type<tc>, window_params = [{transform_indices = @transform_0, window_bounds = array<i64: 1, 1, 20>}, {pipeline_mode = #tpu.pipeline_mode<synchronous>, transform_indices = @transform_1, window_bounds = array<i64: 27, 32>}, {pipeline_mode = #tpu.pipeline_mode<synchronous>, transform_indices = @transform_2, window_bounds = array<i64: 20, 32>}, {pipeline_mode = #tpu.pipeline_mode<synchronous>, transform_indices = @transform_3, window_bounds = array<i64: 2, 32, 32>}, {pipeline_mode = #tpu.pipeline_mode<synchronous>, transform_indices = @transform_4, window_bounds = array<i64: 2, 1, 32>}, {pipeline_mode = #tpu.pipeline_mode<synchronous>, transform_indices = @transform_5, window_bounds = array<i64: 2, 16, 32>}, {pipeline_mode = #tpu.pipeline_mode<synchronous>, transform_indices = @transform_6, window_bounds = array<i64: 2, 1, 32>}, {pipeline_mode = #tpu.pipeline_mode<synchronous>, transform_indices = @transform_7, window_bounds = array<i64: 2, 32, 16>}, {pipeline_mode = #tpu.pipeline_mode<synchronous>, transform_indices = @transform_8, window_bounds = array<i64: 2, 1, 16>}, {pipeline_mode = #tpu.pipeline_mode<synchronous>, transform_indices = @transform_9, window_bounds = array<i64: 2, 16, 32>}, {pipeline_mode = #tpu.pipeline_mode<synchronous>, transform_indices = @transform_10, window_bounds = array<i64: 2, 1, 32>}, {pipeline_mode = #tpu.pipeline_mode<synchronous>, transform_indices = @transform_11, window_bounds = array<i64: 32, 3>}, {pipeline_mode = #tpu.pipeline_mode<synchronous>, transform_indices = @transform_12, window_bounds = array<i64: 1, 3>}, {transform_indices = @transform_13, window_bounds = array<i64: 1, 20, 3>}, {transform_indices = @transform_14, window_bounds = array<i64: 1, 2, 20, 20>}]} {
    %c0 = arith.constant 0 : index
    %c0_0 = arith.constant 0 : index
    %c0_1 = arith.constant 0 : index
    %0 = vector.load %arg1[%c0, %c0_0, %c0_1] : memref<1x1x20xi32, #tpu.memory_space<vmem>>, vector<1x1x20xi32>
    %1 = vector.shape_cast %0 : vector<1x1x20xi32> to vector<1x20xi32>
    %2 = tpu.iota {dimensions = array<i32: 0>} : vector<27x20xi32>
    %3 = vector.broadcast %1 : vector<1x20xi32> to vector<27x20xi32>
    %4 = arith.cmpi eq, %2, %3 : vector<27x20xi32>
    %5 = arith.extui %4 : vector<27x20xi1> to vector<27x20xi32>
    %6 = arith.sitofp %5 : vector<27x20xi32> to vector<27x20xf32>
    %c0_2 = arith.constant 0 : index
    %c0_3 = arith.constant 0 : index
    %7 = vector.load %arg2[%c0_2, %c0_3] : memref<27x32xf32, #tpu.memory_space<vmem>>, vector<27x32xf32>
    %cst = arith.constant dense<0.000000e+00> : vector<20x32xf32>
    %8 = tpu.matmul %6, %7, %cst {dimension_numbers = #tpu.dot_dimension_numbers<[0], [0], [1], [1], [0, 1, 1, 1], [], []>} : vector<27x20xf32>, vector<27x32xf32>, vector<20x32xf32> -> vector<20x32xf32>
    %c0_4 = arith.constant 0 : index
    %c0_5 = arith.constant 0 : index
    %9 = vector.load %arg3[%c0_4, %c0_5] : memref<20x32xf32, #tpu.memory_space<vmem>>, vector<20x32xf32>
    %10 = arith.addf %8, %9 : vector<20x32xf32>
    %c0_6 = arith.constant 0 : index
    %c0_7 = arith.constant 0 : index
    %c0_8 = arith.constant 0 : index
    %11 = vector.load %arg4[%c0_6, %c0_7, %c0_8] : memref<2x32x32xf32, #tpu.memory_space<vmem>>, vector<1x32x32xf32>
    %12 = vector.shape_cast %11 : vector<1x32x32xf32> to vector<32x32xf32>
    %cst_9 = arith.constant dense<0.000000e+00> : vector<20x32xf32>
    %13 = tpu.matmul %10, %12, %cst_9 {dimension_numbers = #tpu.dot_dimension_numbers<[1], [0], [0], [1], [0, 0, 1, 1], [], []>} : vector<20x32xf32>, vector<32x32xf32>, vector<20x32xf32> -> vector<20x32xf32>
    %c0_10 = arith.constant 0 : index
    %c0_11 = arith.constant 0 : index
    %c0_12 = arith.constant 0 : index
    %14 = vector.load %arg5[%c0_10, %c0_11, %c0_12] : memref<2x1x32xf32, #tpu.memory_space<vmem>>, vector<1x1x32xf32>
    %15 = vector.shape_cast %14 : vector<1x1x32xf32> to vector<1x32xf32>
    %16 = vector.broadcast %15 : vector<1x32xf32> to vector<20x32xf32>
    %17 = arith.addf %13, %16 : vector<20x32xf32>
    %18 = vector.extract_strided_slice %17 {offsets = [0, 0], sizes = [20, 16], strides = [1, 1]} : vector<20x32xf32> to vector<20x16xf32>
    %cst_13 = arith.constant 2.500000e-01 : f32
    %19 = vector.broadcast %cst_13 : f32 to vector<20x16xf32>
    %20 = arith.mulf %18, %19 : vector<20x16xf32>
    %21 = vector.extract_strided_slice %17 {offsets = [0, 16], sizes = [20, 16], strides = [1, 1]} : vector<20x32xf32> to vector<20x16xf32>
    %cst_14 = arith.constant dense<0.000000e+00> : vector<20x20xf32>
    %22 = tpu.matmul %20, %21, %cst_14 {dimension_numbers = #tpu.dot_dimension_numbers<[1], [1], [0], [0], [0, 0, 1, 0], [], []>} : vector<20x16xf32>, vector<20x16xf32>, vector<20x20xf32> -> vector<20x20xf32>
    %cst_15 = arith.constant dense<0xFF800000> : vector<20xf32>
    %23 = vector.multi_reduction <maximumf>, %22, %cst_15 [1] : vector<20x20xf32> to vector<20xf32>
    %24 = vector.shape_cast %23 : vector<20xf32> to vector<20x1xf32>
    %25 = vector.broadcast %24 : vector<20x1xf32> to vector<20x20xf32>
    %26 = arith.subf %22, %25 : vector<20x20xf32>
    %27 = math.exp %26 : vector<20x20xf32>
    %cst_16 = arith.constant dense<0.000000e+00> : vector<20xf32>
    %28 = vector.multi_reduction <add>, %27, %cst_16 [1] : vector<20x20xf32> to vector<20xf32>
    %29 = vector.shape_cast %28 : vector<20xf32> to vector<20x1xf32>
    %30 = vector.broadcast %29 : vector<20x1xf32> to vector<20x20xf32>
    %31 = arith.divf %27, %30 : vector<20x20xf32>
    %c0_17 = arith.constant 0 : index
    %c0_18 = arith.constant 0 : index
    %c0_19 = arith.constant 0 : index
    %c0_20 = arith.constant 0 : index
    %32 = vector.load %arg15[%c0_17, %c0_18, %c0_19, %c0_20] : memref<1x2x20x20xf32, #tpu.memory_space<vmem>>, vector<1x1x20x20xf32>
    %33 = vector.shape_cast %32 : vector<1x1x20x20xf32> to vector<20x20xf32>
    %34 = vector.shape_cast %31 : vector<20x20xf32> to vector<1x1x20x20xf32>
    tpu.vector_store %arg15[%c0_17, %c0_18, %c0_19, %c0_20], %34 {strides = array<i32>} : memref<1x2x20x20xf32, #tpu.memory_space<vmem>>, vector<1x1x20x20xf32>,
    %cst_21 = arith.constant dense<0.000000e+00> : vector<20x16xf32>
    %35 = tpu.matmul %31, %21, %cst_21 {dimension_numbers = #tpu.dot_dimension_numbers<[1], [0], [0], [1], [0, 0, 1, 1], [], []>} : vector<20x20xf32>, vector<20x16xf32>, vector<20x16xf32> -> vector<20x16xf32>
    %c0_22 = arith.constant 0 : index
    %c0_23 = arith.constant 0 : index
    %c0_24 = arith.constant 0 : index
    %36 = vector.load %arg6[%c0_22, %c0_23, %c0_24] : memref<2x16x32xf32, #tpu.memory_space<vmem>>, vector<1x16x32xf32>
    %37 = vector.shape_cast %36 : vector<1x16x32xf32> to vector<16x32xf32>
    %cst_25 = arith.constant dense<0.000000e+00> : vector<20x32xf32>
    %38 = tpu.matmul %35, %37, %cst_25 {dimension_numbers = #tpu.dot_dimension_numbers<[1], [0], [0], [1], [0, 0, 1, 1], [], []>} : vector<20x16xf32>, vector<16x32xf32>, vector<20x32xf32> -> vector<20x32xf32>
    %c0_26 = arith.constant 0 : index
    %c0_27 = arith.constant 0 : index
    %c0_28 = arith.constant 0 : index
    %39 = vector.load %arg7[%c0_26, %c0_27, %c0_28] : memref<2x1x32xf32, #tpu.memory_space<vmem>>, vector<1x1x32xf32>
    %40 = vector.shape_cast %39 : vector<1x1x32xf32> to vector<1x32xf32>
    %41 = vector.broadcast %40 : vector<1x32xf32> to vector<20x32xf32>
    %42 = arith.addf %38, %41 : vector<20x32xf32>
    %43 = arith.addf %10, %42 : vector<20x32xf32>
    %c0_29 = arith.constant 0 : index
    %c0_30 = arith.constant 0 : index
    %c0_31 = arith.constant 0 : index
    %44 = vector.load %arg8[%c0_29, %c0_30, %c0_31] : memref<2x32x16xf32, #tpu.memory_space<vmem>>, vector<1x32x16xf32>
    %45 = vector.shape_cast %44 : vector<1x32x16xf32> to vector<32x16xf32>
    %cst_32 = arith.constant dense<0.000000e+00> : vector<20x16xf32>
    %46 = tpu.matmul %43, %45, %cst_32 {dimension_numbers = #tpu.dot_dimension_numbers<[1], [0], [0], [1], [0, 0, 1, 1], [], []>} : vector<20x32xf32>, vector<32x16xf32>, vector<20x16xf32> -> vector<20x16xf32>
    %c0_33 = arith.constant 0 : index
    %c0_34 = arith.constant 0 : index
    %c0_35 = arith.constant 0 : index
    %47 = vector.load %arg9[%c0_33, %c0_34, %c0_35] : memref<2x1x16xf32, #tpu.memory_space<vmem>>, vector<1x1x16xf32>
    %48 = vector.shape_cast %47 : vector<1x1x16xf32> to vector<1x16xf32>
    %49 = vector.broadcast %48 : vector<1x16xf32> to vector<20x16xf32>
    %50 = arith.addf %46, %49 : vector<20x16xf32>
    %cst_36 = arith.constant 0.000000e+00 : f32
    %51 = vector.broadcast %cst_36 : f32 to vector<20x16xf32>
    %52 = arith.maximumf %50, %51 : vector<20x16xf32>
    %c0_37 = arith.constant 0 : index
    %c0_38 = arith.constant 0 : index
    %c0_39 = arith.constant 0 : index
    %53 = vector.load %arg10[%c0_37, %c0_38, %c0_39] : memref<2x16x32xf32, #tpu.memory_space<vmem>>, vector<1x16x32xf32>
    %54 = vector.shape_cast %53 : vector<1x16x32xf32> to vector<16x32xf32>
    %cst_40 = arith.constant dense<0.000000e+00> : vector<20x32xf32>
    %55 = tpu.matmul %52, %54, %cst_40 {dimension_numbers = #tpu.dot_dimension_numbers<[1], [0], [0], [1], [0, 0, 1, 1], [], []>} : vector<20x16xf32>, vector<16x32xf32>, vector<20x32xf32> -> vector<20x32xf32>
    %c0_41 = arith.constant 0 : index
    %c0_42 = arith.constant 0 : index
    %c0_43 = arith.constant 0 : index
    %56 = vector.load %arg11[%c0_41, %c0_42, %c0_43] : memref<2x1x32xf32, #tpu.memory_space<vmem>>, vector<1x1x32xf32>
    %57 = vector.shape_cast %56 : vector<1x1x32xf32> to vector<1x32xf32>
    %58 = vector.broadcast %57 : vector<1x32xf32> to vector<20x32xf32>
    %59 = arith.addf %55, %58 : vector<20x32xf32>
    %60 = arith.addf %59, %43 : vector<20x32xf32>
    %c1 = arith.constant 1 : index
    %c0_44 = arith.constant 0 : index
    %c0_45 = arith.constant 0 : index
    %61 = vector.load %arg4[%c1, %c0_44, %c0_45] : memref<2x32x32xf32, #tpu.memory_space<vmem>>, vector<1x32x32xf32>
    %62 = vector.shape_cast %61 : vector<1x32x32xf32> to vector<32x32xf32>
    %cst_46 = arith.constant dense<0.000000e+00> : vector<20x32xf32>
    %63 = tpu.matmul %60, %62, %cst_46 {dimension_numbers = #tpu.dot_dimension_numbers<[1], [0], [0], [1], [0, 0, 1, 1], [], []>} : vector<20x32xf32>, vector<32x32xf32>, vector<20x32xf32> -> vector<20x32xf32>
    %c1_47 = arith.constant 1 : index
    %c0_48 = arith.constant 0 : index
    %c0_49 = arith.constant 0 : index
    %64 = vector.load %arg5[%c1_47, %c0_48, %c0_49] : memref<2x1x32xf32, #tpu.memory_space<vmem>>, vector<1x1x32xf32>
    %65 = vector.shape_cast %64 : vector<1x1x32xf32> to vector<1x32xf32>
    %66 = vector.broadcast %65 : vector<1x32xf32> to vector<20x32xf32>
    %67 = arith.addf %63, %66 : vector<20x32xf32>
    %68 = vector.extract_strided_slice %67 {offsets = [0, 0], sizes = [20, 16], strides = [1, 1]} : vector<20x32xf32> to vector<20x16xf32>
    %cst_50 = arith.constant 2.500000e-01 : f32
    %69 = vector.broadcast %cst_50 : f32 to vector<20x16xf32>
    %70 = arith.mulf %68, %69 : vector<20x16xf32>
    %71 = vector.extract_strided_slice %67 {offsets = [0, 16], sizes = [20, 16], strides = [1, 1]} : vector<20x32xf32> to vector<20x16xf32>
    %cst_51 = arith.constant dense<0.000000e+00> : vector<20x20xf32>
    %72 = tpu.matmul %70, %71, %cst_51 {dimension_numbers = #tpu.dot_dimension_numbers<[1], [1], [0], [0], [0, 0, 1, 0], [], []>} : vector<20x16xf32>, vector<20x16xf32>, vector<20x20xf32> -> vector<20x20xf32>
    %cst_52 = arith.constant dense<0xFF800000> : vector<20xf32>
    %73 = vector.multi_reduction <maximumf>, %72, %cst_52 [1] : vector<20x20xf32> to vector<20xf32>
    %74 = vector.shape_cast %73 : vector<20xf32> to vector<20x1xf32>
    %75 = vector.broadcast %74 : vector<20x1xf32> to vector<20x20xf32>
    %76 = arith.subf %72, %75 : vector<20x20xf32>
    %77 = math.exp %76 : vector<20x20xf32>
    %cst_53 = arith.constant dense<0.000000e+00> : vector<20xf32>
    %78 = vector.multi_reduction <add>, %77, %cst_53 [1] : vector<20x20xf32> to vector<20xf32>
    %79 = vector.shape_cast %78 : vector<20xf32> to vector<20x1xf32>
    %80 = vector.broadcast %79 : vector<20x1xf32> to vector<20x20xf32>
    %81 = arith.divf %77, %80 : vector<20x20xf32>
    %c0_54 = arith.constant 0 : index
    %c1_55 = arith.constant 1 : index
    %c0_56 = arith.constant 0 : index
    %c0_57 = arith.constant 0 : index
    %82 = vector.load %arg15[%c0_54, %c1_55, %c0_56, %c0_57] : memref<1x2x20x20xf32, #tpu.memory_space<vmem>>, vector<1x1x20x20xf32>
    %83 = vector.shape_cast %82 : vector<1x1x20x20xf32> to vector<20x20xf32>
    %84 = vector.shape_cast %81 : vector<20x20xf32> to vector<1x1x20x20xf32>
    tpu.vector_store %arg15[%c0_54, %c1_55, %c0_56, %c0_57], %84 {strides = array<i32>} : memref<1x2x20x20xf32, #tpu.memory_space<vmem>>, vector<1x1x20x20xf32>,
    %cst_58 = arith.constant dense<0.000000e+00> : vector<20x16xf32>
    %85 = tpu.matmul %81, %71, %cst_58 {dimension_numbers = #tpu.dot_dimension_numbers<[1], [0], [0], [1], [0, 0, 1, 1], [], []>} : vector<20x20xf32>, vector<20x16xf32>, vector<20x16xf32> -> vector<20x16xf32>
    %c1_59 = arith.constant 1 : index
    %c0_60 = arith.constant 0 : index
    %c0_61 = arith.constant 0 : index
    %86 = vector.load %arg6[%c1_59, %c0_60, %c0_61] : memref<2x16x32xf32, #tpu.memory_space<vmem>>, vector<1x16x32xf32>
    %87 = vector.shape_cast %86 : vector<1x16x32xf32> to vector<16x32xf32>
    %cst_62 = arith.constant dense<0.000000e+00> : vector<20x32xf32>
    %88 = tpu.matmul %85, %87, %cst_62 {dimension_numbers = #tpu.dot_dimension_numbers<[1], [0], [0], [1], [0, 0, 1, 1], [], []>} : vector<20x16xf32>, vector<16x32xf32>, vector<20x32xf32> -> vector<20x32xf32>
    %c1_63 = arith.constant 1 : index
    %c0_64 = arith.constant 0 : index
    %c0_65 = arith.constant 0 : index
    %89 = vector.load %arg7[%c1_63, %c0_64, %c0_65] : memref<2x1x32xf32, #tpu.memory_space<vmem>>, vector<1x1x32xf32>
    %90 = vector.shape_cast %89 : vector<1x1x32xf32> to vector<1x32xf32>
    %91 = vector.broadcast %90 : vector<1x32xf32> to vector<20x32xf32>
    %92 = arith.addf %88, %91 : vector<20x32xf32>
    %93 = arith.addf %60, %92 : vector<20x32xf32>
    %c1_66 = arith.constant 1 : index
    %c0_67 = arith.constant 0 : index
    %c0_68 = arith.constant 0 : index
    %94 = vector.load %arg8[%c1_66, %c0_67, %c0_68] : memref<2x32x16xf32, #tpu.memory_space<vmem>>, vector<1x32x16xf32>
    %95 = vector.shape_cast %94 : vector<1x32x16xf32> to vector<32x16xf32>
    %cst_69 = arith.constant dense<0.000000e+00> : vector<20x16xf32>
    %96 = tpu.matmul %93, %95, %cst_69 {dimension_numbers = #tpu.dot_dimension_numbers<[1], [0], [0], [1], [0, 0, 1, 1], [], []>} : vector<20x32xf32>, vector<32x16xf32>, vector<20x16xf32> -> vector<20x16xf32>
    %c1_70 = arith.constant 1 : index
    %c0_71 = arith.constant 0 : index
    %c0_72 = arith.constant 0 : index
    %97 = vector.load %arg9[%c1_70, %c0_71, %c0_72] : memref<2x1x16xf32, #tpu.memory_space<vmem>>, vector<1x1x16xf32>
    %98 = vector.shape_cast %97 : vector<1x1x16xf32> to vector<1x16xf32>
    %99 = vector.broadcast %98 : vector<1x16xf32> to vector<20x16xf32>
    %100 = arith.addf %96, %99 : vector<20x16xf32>
    %cst_73 = arith.constant 0.000000e+00 : f32
    %101 = vector.broadcast %cst_73 : f32 to vector<20x16xf32>
    %102 = arith.maximumf %100, %101 : vector<20x16xf32>
    %c1_74 = arith.constant 1 : index
    %c0_75 = arith.constant 0 : index
    %c0_76 = arith.constant 0 : index
    %103 = vector.load %arg10[%c1_74, %c0_75, %c0_76] : memref<2x16x32xf32, #tpu.memory_space<vmem>>, vector<1x16x32xf32>
    %104 = vector.shape_cast %103 : vector<1x16x32xf32> to vector<16x32xf32>
    %cst_77 = arith.constant dense<0.000000e+00> : vector<20x32xf32>
    %105 = tpu.matmul %102, %104, %cst_77 {dimension_numbers = #tpu.dot_dimension_numbers<[1], [0], [0], [1], [0, 0, 1, 1], [], []>} : vector<20x16xf32>, vector<16x32xf32>, vector<20x32xf32> -> vector<20x32xf32>
    %c1_78 = arith.constant 1 : index
    %c0_79 = arith.constant 0 : index
    %c0_80 = arith.constant 0 : index
    %106 = vector.load %arg11[%c1_78, %c0_79, %c0_80] : memref<2x1x32xf32, #tpu.memory_space<vmem>>, vector<1x1x32xf32>
    %107 = vector.shape_cast %106 : vector<1x1x32xf32> to vector<1x32xf32>
    %108 = vector.broadcast %107 : vector<1x32xf32> to vector<20x32xf32>
    %109 = arith.addf %105, %108 : vector<20x32xf32>
    %110 = arith.addf %109, %93 : vector<20x32xf32>
    %c0_81 = arith.constant 0 : index
    %c0_82 = arith.constant 0 : index
    %111 = vector.load %arg12[%c0_81, %c0_82] : memref<32x3xf32, #tpu.memory_space<vmem>>, vector<32x3xf32>
    %cst_83 = arith.constant dense<0.000000e+00> : vector<20x3xf32>
    %112 = tpu.matmul %110, %111, %cst_83 {dimension_numbers = #tpu.dot_dimension_numbers<[1], [0], [0], [1], [0, 0, 1, 1], [], []>} : vector<20x32xf32>, vector<32x3xf32>, vector<20x3xf32> -> vector<20x3xf32>
    %c0_84 = arith.constant 0 : index
    %c0_85 = arith.constant 0 : index
    %113 = vector.load %arg13[%c0_84, %c0_85] : memref<1x3xf32, #tpu.memory_space<vmem>>, vector<1x3xf32>
    %114 = vector.broadcast %113 : vector<1x3xf32> to vector<20x3xf32>
    %115 = arith.addf %112, %114 : vector<20x3xf32>
    %cst_86 = arith.constant dense<0xFF800000> : vector<20xf32>
    %116 = vector.multi_reduction <maximumf>, %115, %cst_86 [1] : vector<20x3xf32> to vector<20xf32>
    %117 = vector.shape_cast %116 : vector<20xf32> to vector<20x1xf32>
    %118 = vector.broadcast %117 : vector<20x1xf32> to vector<20x3xf32>
    %119 = arith.subf %115, %118 : vector<20x3xf32>
    %120 = math.exp %119 : vector<20x3xf32>
    %cst_87 = arith.constant dense<0.000000e+00> : vector<20xf32>
    %121 = vector.multi_reduction <add>, %120, %cst_87 [1] : vector<20x3xf32> to vector<20xf32>
    %122 = vector.shape_cast %121 : vector<20xf32> to vector<20x1xf32>
    %123 = math.log %122 : vector<20x1xf32>
    %124 = arith.addf %123, %117 : vector<20x1xf32>
    %125 = vector.broadcast %124 : vector<20x1xf32> to vector<20x3xf32>
    %126 = arith.subf %115, %125 : vector<20x3xf32>
    %c0_88 = arith.constant 0 : index
    %c0_89 = arith.constant 0 : index
    %c0_90 = arith.constant 0 : index
    %127 = vector.load %arg14[%c0_88, %c0_89, %c0_90] : memref<1x20x3xf32, #tpu.memory_space<vmem>>, vector<1x20x3xf32>
    %128 = vector.shape_cast %127 : vector<1x20x3xf32> to vector<20x3xf32>
    %129 = vector.shape_cast %126 : vector<20x3xf32> to vector<1x20x3xf32>
    tpu.vector_store %arg14[%c0_88, %c0_89, %c0_90], %129 {strides = array<i32>} : memref<1x20x3xf32, #tpu.memory_space<vmem>>, vector<1x20x3xf32>,
    return
  }
  func.func @transform_0(%arg0: i32) -> (i32, i32, i32) {
    %c0_i32 = arith.constant 0 : i32
    %c0_i32_0 = arith.constant 0 : i32
    %c0_i32_1 = arith.constant 0 : i32
    return %arg0, %c0_i32, %c0_i32_0 : i32, i32, i32
  }
  func.func @transform_1(%arg0: i32) -> (i32, i32) {
    %c0_i32 = arith.constant 0 : i32
    %c0_i32_0 = arith.constant 0 : i32
    %c0_i32_1 = arith.constant 0 : i32
    return %c0_i32, %c0_i32_0 : i32, i32
  }
  func.func @transform_2(%arg0: i32) -> (i32, i32) {
    %c0_i32 = arith.constant 0 : i32
    %c0_i32_0 = arith.constant 0 : i32
    %c0_i32_1 = arith.constant 0 : i32
    return %c0_i32, %c0_i32_0 : i32, i32
  }
  func.func @transform_3(%arg0: i32) -> (i32, i32, i32) {
    %c0_i32 = arith.constant 0 : i32
    %c0_i32_0 = arith.constant 0 : i32
    %c0_i32_1 = arith.constant 0 : i32
    %c0_i32_2 = arith.constant 0 : i32
    return %c0_i32, %c0_i32_0, %c0_i32_1 : i32, i32, i32
  }
  func.func @transform_4(%arg0: i32) -> (i32, i32, i32) {
    %c0_i32 = arith.constant 0 : i32
    %c0_i32_0 = arith.constant 0 : i32
    %c0_i32_1 = arith.constant 0 : i32
    %c0_i32_2 = arith.constant 0 : i32
    return %c0_i32, %c0_i32_0, %c0_i32_1 : i32, i32, i32
  }
  func.func @transform_5(%arg0: i32) -> (i32, i32, i32) {
    %c0_i32 = arith.constant 0 : i32
    %c0_i32_0 = arith.constant 0 : i32
    %c0_i32_1 = arith.constant 0 : i32
    %c0_i32_2 = arith.constant 0 : i32
    return %c0_i32, %c0_i32_0, %c0_i32_1 : i32, i32, i32
  }
  func.func @transform_6(%arg0: i32) -> (i32, i32, i32) {
    %c0_i32 = arith.constant 0 : i32
    %c0_i32_0 = arith.constant 0 : i32
    %c0_i32_1 = arith.constant 0 : i32
    %c0_i32_2 = arith.constant 0 : i32
    return %c0_i32, %c0_i32_0, %c0_i32_1 : i32, i32, i32
  }
  func.func @transform_7(%arg0: i32) -> (i32, i32, i32) {
    %c0_i32 = arith.constant 0 : i32
    %c0_i32_0 = arith.constant 0 : i32
    %c0_i32_1 = arith.constant 0 : i32
    %c0_i32_2 = arith.constant 0 : i32
    return %c0_i32, %c0_i32_0, %c0_i32_1 : i32, i32, i32
  }
  func.func @transform_8(%arg0: i32) -> (i32, i32, i32) {
    %c0_i32 = arith.constant 0 : i32
    %c0_i32_0 = arith.constant 0 : i32
    %c0_i32_1 = arith.constant 0 : i32
    %c0_i32_2 = arith.constant 0 : i32
    return %c0_i32, %c0_i32_0, %c0_i32_1 : i32, i32, i32
  }
  func.func @transform_9(%arg0: i32) -> (i32, i32, i32) {
    %c0_i32 = arith.constant 0 : i32
    %c0_i32_0 = arith.constant 0 : i32
    %c0_i32_1 = arith.constant 0 : i32
    %c0_i32_2 = arith.constant 0 : i32
    return %c0_i32, %c0_i32_0, %c0_i32_1 : i32, i32, i32
  }
  func.func @transform_10(%arg0: i32) -> (i32, i32, i32) {
    %c0_i32 = arith.constant 0 : i32
    %c0_i32_0 = arith.constant 0 : i32
    %c0_i32_1 = arith.constant 0 : i32
    %c0_i32_2 = arith.constant 0 : i32
    return %c0_i32, %c0_i32_0, %c0_i32_1 : i32, i32, i32
  }
  func.func @transform_11(%arg0: i32) -> (i32, i32) {
    %c0_i32 = arith.constant 0 : i32
    %c0_i32_0 = arith.constant 0 : i32
    %c0_i32_1 = arith.constant 0 : i32
    return %c0_i32, %c0_i32_0 : i32, i32
  }
  func.func @transform_12(%arg0: i32) -> (i32, i32) {
    %c0_i32 = arith.constant 0 : i32
    %c0_i32_0 = arith.constant 0 : i32
    %c0_i32_1 = arith.constant 0 : i32
    return %c0_i32, %c0_i32_0 : i32, i32
  }
  func.func @transform_13(%arg0: i32) -> (i32, i32, i32) {
    %c0_i32 = arith.constant 0 : i32
    %c0_i32_0 = arith.constant 0 : i32
    %c0_i32_1 = arith.constant 0 : i32
    return %arg0, %c0_i32, %c0_i32_0 : i32, i32, i32
  }
  func.func @transform_14(%arg0: i32) -> (i32, i32, i32, i32) {
    %c0_i32 = arith.constant 0 : i32
    %c0_i32_0 = arith.constant 0 : i32
    %c0_i32_1 = arith.constant 0 : i32
    %c0_i32_2 = arith.constant 0 : i32
    return %arg0, %c0_i32, %c0_i32_0, %c0_i32_1 : i32, i32, i32, i32
  }
}

</mosaic_0001>

<bundles_post_ra>
// kernel: transformer_forward.1
= control target key start
LH: loop header
LB: loop body
LE: loop exit
PB: predicated region body
PF: predicated region fallthrough
CT: control target
= control target key end

     0   :  { %s3708_s0 = inlined_call_operand.vmem [shape: s32[8,1,20], index: 0, kind: input, shape index: {}]   ;;  %s3709_s1 = inlined_call_operand.vmem [shape: f32[27,32], index: 1, kind: input, shape index: {}]   ;;  %s3710_s2 = inlined_call_operand.hbm [shape: f32[20,32], index: 2, kind: input, shape index: {}]   ;;  %s3711_s3 = inlined_call_operand.vmem [shape: f32[2,32,32], index: 3, kind: input, shape index: {}]   ;;  %s3712_s4 = inlined_call_operand.hbm [shape: f32[2,1,32], index: 4, kind: input, shape index: {}]   ;;  %s3713_s5 = inlined_call_operand.vmem [shape: f32[2,16,32], index: 5, kind: input, shape index: {}]   ;;  %s3714_s6 = inlined_call_operand.hbm [shape: f32[2,1,32], index: 6, kind: input, shape index: {}]   ;;  %s3715_s7 = inlined_call_operand.vmem [shape: f32[2,32,16], index: 7, kind: input, shape index: {}]   ;;  %s3716_s8 = inlined_call_operand.hbm [shape: f32[2,1,16], index: 8, kind: input, shape index: {}]   ;;  %s3717_s9 = inlined_call_operand.hbm [shape: f32[2,16,32], index: 9, kind: input, shape index: {}]   ;;  %s3718_s10 = inlined_call_operand.hbm [shape: f32[2,1,32], index: 10, kind: input, shape index: {}]   ;;  %s3719_s11 = inlined_call_operand.vmem [shape: f32[32,3], index: 11, kind: input, shape index: {}]   ;;  %s3720_s12 = inlined_call_operand.vmem [shape: f32[1,3], index: 12, kind: input, shape index: {}]   ;;  %s3721_s13 = inlined_call_operand.vmem [shape: f32[8,20,3], index: 13, kind: output, shape index: {0}]   ;;  %s3722_s14 = inlined_call_operand.vmem [shape: f32[8,2,20,20], index: 14, kind: output, shape index: {1}]  }
   0x1   :  { %3731 = sst [smem:[#allocation17_spill]] %s3710_s2 }
   0x2   :  { %3732 = sst [smem:[#allocation18_spill]] %s3712_s4 }
   0x3   :  { %3733 = sst [smem:[#allocation19_spill]] %s3720_s12 }
   0x4   :  { %3734 = sst [smem:[#allocation20_spill]] %s3721_s13 }
   0x5   :  { %20 = vsyncpa [#allocation3], 0 }
   0x6   :  { %21 = vsyncpa [#allocation5], 0 }
   0x7   :  { %22 = vsyncpa [#allocation8], 0 }
   0x8   :  { %23 = vsyncpa [#allocation11], 0  ;;  %s3173_s29 = smov 0  }
   0x9 LB: > { %3735 = sst [smem:[#allocation16_spill]] %s3081_s29  ;;  %s3083_s30 = smov [#allocation4]   ;;  %s3081_s29 = sphi %s3173_s29, %s29_s29  }
   0xa   : > { %s395_s15 = sshll.u32 %s3083_s30, 4  ;;  %s3179_s16 = sadd.s32 4294967295, %s3081_s29   ;;  %s3184_s15 = int_to_ptr.vmem [resolvable:$true] %s395_s15 }
   0xb   : > { %p2305_p0 = scmp.ge.s32.totalorder %s3081_s29, 1  ;;  %p364_p1 = scmp.lt.s32.totalorder %s3081_s29, 9 }
   0xc   : > { %p3728_p2 = scmp.eq.s32.totalorder %s3179_s16, 0  ;;  %s3084_s18 = smov [#allocation7]  }
   0xd   : > { %p3186_p3 = pnand %p2305_p0, %p364_p1  ;;  %s427_s19 = sshll.u32 %s3084_s18, 4  ;;  %s3192_s19 = int_to_ptr.vmem [resolvable:$true] %s427_s19 }
   0xe   : > { %s3085_s21 = smov [#allocation2]   ;;  %s3738_s4 = sld [smem:[#allocation18_spill]] }
   0xf   : > { %s3736_s17 = scalar_select %p3186_p3, 1, 0 }
  0x10   : > { %p2791_p4 = pneg %p3186_p3  ;;  %s379_s22 = sshll.u32 %s3085_s21, 4  ;;  %s3200_s22 = int_to_ptr.vmem [resolvable:$true] %s379_s22 }
  0x12   : > { %p3196_p5 = pnand %p3728_p2, %p2791_p4 }
  0x14   : > { %s2891_s25 = scalar_lea.hbm %s3738_s4, 32  ;;  %p3210_p7 = pneg %p3196_p5 }
  0x15   : > { %p2892_p6 = scmp.ne.s32.totalorder %s3738_s4, %s2891_s25  ;;  %p2898_p10 = scmp.lt.u32.totalorder %s2891_s25, %s3738_s4 }
  0x17   : > { %p2894_p8 = pnand %p3210_p7, %p2892_p6 }
  0x19   : > { %p2895_p9 = pneg %p2894_p8 }
  0x1b   : > { %p2900_p11 = pnand %p2898_p10, %p2895_p9 }
  0x1d   : > { %2903 = shalt.err (!%p2900_p11)
}
  0x1e   : > { %s2904_s21 = scalar_lea.vmem %s3184_s15, 32  ;;  %p2912_p1 = scmp.lt.s32.totalorder %s3184_s15, %s3184_s15 }
  0x1f   : > { %p2905_p12 = scmp.ne.s32.totalorder %s3184_s15, %s2904_s21  ;;  %p2913_p4 = scmp.lt.s32.totalorder %s2904_s21, %s2904_s21 }
  0x21   : > { %p2907_p13 = pnand %p2905_p12, %p3210_p7  ;;  %p2914_p6 = por %p2913_p4, %p2912_p1 }
  0x23   : > { %p2908_p0 = pneg %p2907_p13 }
  0x25   : > { %p2915_p8 = pnand %p2914_p6, %p2908_p0 }
  0x27   : > { %2918 = shalt.err (!%p2915_p8)
}
  0x28   : > { %s3724_s23 = smov 16   ;;  %s3726_s24 = smov 1  }
  0x29   : > { %2797 = dma.hbm_to_vmem [thread:$0]  (!%p3196_p5), %s3738_s4, 32, %s3184_s15, [#allocation5], %s3724_s23, %s3724_s23, %s3726_s24  }
  0x2a   : > { %s2919_s18 = scalar_lea.hbm %s3716_s8, 32 }
  0x2b   : > { %p2920_p9 = scmp.ne.s32.totalorder %s3716_s8, %s2919_s18  ;;  %p2926_p12 = scmp.lt.u32.totalorder %s2919_s18, %s3716_s8 }
  0x2d   : > { %p2922_p10 = pnand %p2920_p9, %p3210_p7 }
  0x2f   : > { %p2923_p11 = pneg %p2922_p10 }
  0x31   : > { %p2928_p13 = pnand %p2926_p12, %p2923_p11 }
  0x33   : > { %2931 = shalt.err (!%p2928_p13)
}
  0x34   : > { %s2932_s15 = scalar_lea.vmem %s3192_s19, 32  ;;  %p2940_p6 = scmp.lt.s32.totalorder %s3192_s19, %s3192_s19 }
  0x35   : > { %p2933_p0 = scmp.ne.s32.totalorder %s3192_s19, %s2932_s15  ;;  %p2941_p8 = scmp.lt.s32.totalorder %s2932_s15, %s2932_s15 }
  0x37   : > { %p2935_p1 = pnand %p2933_p0, %p3210_p7  ;;  %p2942_p9 = por %p2941_p8, %p2940_p6 }
  0x39   : > { %p2936_p4 = pneg %p2935_p1 }
  0x3b   : > { %p2943_p10 = pnand %p2942_p9, %p2936_p4 }
  0x3d   : > { %2946 = shalt.err (!%p2943_p10)
}
  0x3e   : > { %2803 = dma.hbm_to_vmem [thread:$0]  (!%p3196_p5), %s3716_s8, 32, %s3192_s19, [#allocation8], %s3724_s23, %s3724_s23, %s3726_s24  }
  0x3f   : > { %s3740_s2 = sld [smem:[#allocation17_spill]] }
  0x45   : > { %s2947_s26 = scalar_lea.hbm %s3740_s2, 384 }
  0x46   : > { %p2948_p11 = scmp.ne.s32.totalorder %s3740_s2, %s2947_s26  ;;  %p2954_p0 = scmp.lt.u32.totalorder %s2947_s26, %s3740_s2 }
  0x48   : > { %p2950_p12 = pnand %p2948_p11, %p3210_p7 }
  0x4a   : > { %p2951_p13 = pneg %p2950_p12 }
  0x4c   : > { %p2956_p1 = pnand %p2954_p0, %p2951_p13 }
  0x4e   : > { %2959 = shalt.err (!%p2956_p1)
}
  0x4f   : > { %s2960_s19 = scalar_lea.vmem %s3200_s22, 384  ;;  %p2968_p9 = scmp.lt.s32.totalorder %s3200_s22, %s3200_s22 }
  0x50   : > { %p2961_p4 = scmp.ne.s32.totalorder %s3200_s22, %s2960_s19  ;;  %p2969_p10 = scmp.lt.s32.totalorder %s2960_s19, %s2960_s19 }
  0x52   : > { %p2963_p6 = pnand %p2961_p4, %p3210_p7  ;;  %p2970_p11 = por %p2969_p10, %p2968_p9 }
  0x54   : > { %p2964_p8 = pneg %p2963_p6 }
  0x56   : > { %p2971_p12 = pnand %p2970_p11, %p2964_p8 }
  0x58   : > { %2974 = shalt.err (!%p2971_p12)
}
  0x59   : > { %s3730_s15 = smov 128   ;;  %s3089_s12 = smov 8  }
  0x5a   : > { %2794 = dma.hbm_to_vmem [thread:$0]  (!%p3196_p5), %s3740_s2, 384, %s3200_s22, [#allocation3], %s3730_s15, %s3730_s15, %s3089_s12  }
  0x5b   : > { %s3090_s25 = smov [#allocation6]   ;;  %s3091_s27 = smov [#allocation9]  }
  0x5c   : > { %s411_s26 = sshll.u32 %s3090_s25, 4  ;;  %s440_s30 = sshll.u32 %s3091_s27, 4  ;;  %s412_s26 = int_to_ptr.vmem [resolvable:$true] %s411_s26  ;;  %s3286_s30 = int_to_ptr.vmem [resolvable:$true] %s440_s30 }
  0x5d   : > { %s2975_s19 = scalar_lea.hbm %s3714_s6, 32 }
  0x5e   : > { %p2976_p13 = scmp.ne.s32.totalorder %s3714_s6, %s2975_s19  ;;  %p2982_p4 = scmp.lt.u32.totalorder %s2975_s19, %s3714_s6 }
  0x60   : > { %p2978_p0 = pnand %p2976_p13, %p3210_p7 }
  0x62   : > { %p2979_p1 = pneg %p2978_p0 }
  0x64   : > { %p2984_p6 = pnand %p2982_p4, %p2979_p1 }
  0x66   : > { %2987 = shalt.err (!%p2984_p6)
}
  0x67   : > { %s2988_s29 = scalar_lea.vmem %s412_s26, 32  ;;  %p2996_p11 = scmp.lt.s32.totalorder %s412_s26, %s412_s26 }
  0x68   : > { %p2989_p8 = scmp.ne.s32.totalorder %s412_s26, %s2988_s29  ;;  %p2997_p12 = scmp.lt.s32.totalorder %s2988_s29, %s2988_s29 }
  0x6a   : > { %p2991_p9 = pnand %p2989_p8, %p3210_p7  ;;  %p2998_p2 = por %p2997_p12, %p2996_p11 }
  0x6c   : > { %p2992_p10 = pneg %p2991_p9 }
  0x6e   : > { %p2999_p3 = pnand %p2998_p2, %p2992_p10 }
  0x70   : > { %3002 = shalt.err (!%p2999_p3)
}
  0x71   : > { %s3741_s23 = smov 1   ;;  %s3742_s24 = smov 16  }
  0x72   : > { %2800 = dma.hbm_to_vmem [thread:$0]  (!%p3196_p5), %s3714_s6, 32, %s412_s26, [#allocation5], %s3742_s24, %s3742_s24, %s3741_s23  }
  0x73   : > { %s3003_s19 = scalar_lea.hbm %s3717_s9, 512 }
  0x74   : > { %p3004_p13 = scmp.ne.s32.totalorder %s3717_s9, %s3003_s19  ;;  %p3010_p0 = scmp.lt.u32.totalorder %s3003_s19, %s3717_s9 }
  0x76   : > { %p3006_p2 = pnand %p3004_p13, %p3210_p7 }
  0x78   : > { %p3007_p3 = pneg %p3006_p2 }
  0x7a   : > { %p3012_p1 = pnand %p3010_p0, %p3007_p3 }
  0x7c   : > { %3015 = shalt.err (!%p3012_p1)
}
  0x7d   : > { %s3016_s26 = scalar_lea.vmem %s3286_s30, 512  ;;  %p3024_p9 = scmp.lt.s32.totalorder %s3286_s30, %s3286_s30 }
  0x7e   : > { %p3017_p4 = scmp.ne.s32.totalorder %s3286_s30, %s3016_s26  ;;  %p3025_p10 = scmp.lt.s32.totalorder %s3016_s26, %s3016_s26 }
  0x80   : > { %p3019_p6 = pnand %p3017_p4, %p3210_p7  ;;  %p3026_p11 = por %p3025_p10, %p3024_p9 }
  0x82   : > { %p3020_p8 = pneg %p3019_p6 }
  0x84   : > { %p3027_p12 = pnand %p3026_p11, %p3020_p8 }
  0x86   : > { %3030 = shalt.err (!%p3027_p12)
}
  0x87   : > { %s3743_s15 = smov 128   ;;  %s3092_s18 = smov [#allocation10]  }
  0x88   : > { %2806 = dma.hbm_to_vmem [thread:$0]  (!%p3196_p5), %s3717_s9, 512, %s3286_s30, [#allocation8], %s3743_s15, %s3743_s15, %s3089_s12  }
  0x89   : > { %s453_s21 = sshll.u32 %s3092_s18, 4  ;;  %s3031_s22 = scalar_lea.hbm %s3718_s10, 32  ;;  %s454_s21 = int_to_ptr.vmem [resolvable:$true] %s453_s21 }
  0x8a   : > { %p3032_p13 = scmp.ne.s32.totalorder %s3718_s10, %s3031_s22  ;;  %p3038_p0 = scmp.lt.u32.totalorder %s3031_s22, %s3718_s10 }
  0x8c   : > { %p3034_p2 = pnand %p3032_p13, %p3210_p7 }
  0x8e   : > { %p3035_p3 = pneg %p3034_p2 }
  0x90   : > { %p3040_p1 = pnand %p3038_p0, %p3035_p3 }
  0x92   : > { %3043 = shalt.err (!%p3040_p1)
}
  0x93   : > { %s3044_s12 = scalar_lea.vmem %s454_s21, 32  ;;  %p3052_p9 = scmp.lt.s32.totalorder %s454_s21, %s454_s21 }
  0x94   : > { %p3045_p4 = scmp.ne.s32.totalorder %s454_s21, %s3044_s12  ;;  %p3053_p10 = scmp.lt.s32.totalorder %s3044_s12, %s3044_s12 }
  0x96   : > { %p3047_p6 = pnand %p3045_p4, %p3210_p7  ;;  %p3054_p11 = por %p3053_p10, %p3052_p9 }
  0x98   : > { %p3048_p8 = pneg %p3047_p6 }
  0x9a   : > { %p3055_p12 = pnand %p3054_p11, %p3048_p8 }
  0x9c   : > { %3058 = shalt.err (!%p3055_p12)
}
  0x9d   : > { %2809 = dma.hbm_to_vmem [thread:$0]  (!%p3196_p5), %s3718_s10, 32, %s454_s21, [#allocation11], %s3742_s24, %s3742_s24, %s3741_s23  }
  0x9e   : > { %p3744_p13 = scmp.ne.s32.totalorder %s3736_s17, 0 }
  0x9f   : > { %p3745_p7 = scmp.eq.s32.totalorder (!%p3744_p13), %s3179_s16, 0 }
  0xa0   : > { %481 = sbr.rel (%p3744_p13) target bundleno = 4541 (0x11bd), region = 72 }
  0xa7   : > { %3064 = dma.done.wait (%p3745_p7), [#allocation3], 384   ;;  %p3746_p2 = pmov %p3745_p7 }
  0xa9   : > { %3066 = vsyncadd (%p3746_p2), [#allocation3], 4294966912  ;;  %p3747_p3 = pmov %p3746_p2 }
  0xaa   : > { %p3748_p0 = pmov %p3746_p2 }
  0xab   : > { %3068 = dma.done.wait (%p3747_p3), [#allocation5], 64  }
  0xac   : > { %3070 = vsyncadd (%p3748_p0), [#allocation5], 4294967232  ;;  %p3749_p1 = pmov %p3748_p0 }
  0xad   : > { %p3750_p5 = pmov %p3748_p0 }
  0xae   : > { %3072 = dma.done.wait (%p3749_p1), [#allocation8], 544  }
  0xaf   : > { %3074 = vsyncadd (%p3750_p5), [#allocation8], 4294966752  ;;  %p3751_p4 = pmov %p3748_p0 }
  0xb0   : > { %p3752_p6 = pmov %p3748_p0 }
  0xb1   : > { %3076 = dma.done.wait (%p3751_p4), [#allocation11], 32  }
  0xb2   : > { %3078 = vsyncadd (%p3752_p6), [#allocation11], 4294967264  ;;  %p550_p8 = scmp.lt.s32.totalorder %s3179_s16, 7  ;;  %v564_v0 = vlaneseq  ;;  %v3093_v1 = vmov 0.0|0.0   ;;  %vm3094_vm0 = vmmov 0   ;;  %v3095_v3 = vmov 0.0  }
  0xb3   : > { %2702 = vmatprep.subr.bf16.mxu0 %v3093_v1  ;;  %2709 = vmatprep.subr.bf16.mxu1 %v3093_v1  ;;  %v585_v6 = vld [vmem:[%s3709_s1] sm:$0xff]  ;;  %v586_v7 = vld [vmem:[%s3709_s1 + $0x8] sm:$0xff]  ;;  %v587_v10 = vld [vmem:[%s3709_s1 + $0x10] sm:$0xff]  ;;  %vm634_vm3 = vcmask 1042432   ;;  %vm3096_vm5 = vmmov 1   ;;  %vm624_vm8 = vcmask 220160  }
  0xb4   : > { %s3759_s16 = smov (!%p550_p8, %s3179_s16), 7  ;;  %v565_v2 = vshrl.u32 %v564_v0, 7  ;;  %2496 = vmatprep.mubr.msk.f32.mxu0 %vm3094_vm0, %v3095_v3  ;;  %2513 = vmatprep.mubr.msk.f32.mxu1 %vm3094_vm0, %v3095_v3  ;;  %v588_v11 = vld [vmem:[%s3709_s1 + $0x18] sm:$0x7]  ;;  %v2703_v12 = vpack.c.bf16 %v586_v7, %v585_v6  ;;  %vm2707_vm6 = vmpackc.low %vm634_vm3, %vm3096_vm5  ;;  %v718_v18 = vld [vmem:[%s3711_s3] sm:$0xff]  ;;  %vm729_vm9 = vcmask 261120  }
  0xb5   : > { %s552_s28 = scalar_lea.vmem %s3708_s0, %s3759_s16  ;;  %v2706_v15 = vpack.c.bf16 %v588_v11, %v587_v10  ;;  %v719_v19 = vld [vmem:[%s3711_s3 + $0x8] sm:$0xff]  ;;  %v720_v24 = vld [vmem:[%s3711_s3 + $0x10] sm:$0xff]  ;;  %v721_v25 = vld [vmem:[%s3711_s3 + $0x18] sm:$0xff]  ;;  %s3097_s17 = smov 112   ;;  %vm831_vm10 = vcmask 130048   ;;  %vm976_vm12 = vcmask 1043456  }
  0xb6   : > { %v566_v4 = vadd.s32 8, %v565_v2  ;;  %v2322_v5 = vld [vmem:[%s552_s28] ss:$0 sm:$0xff]  ;;  %v567_v8 = vadd.s32 16, %v565_v2  ;;  %v568_v14 = vadd.s32 24, %v565_v2  ;;  %2704 = vmatpush3.bf16.msra.mxu0 %v2703_v12  ;;  %v2710_v20 = vpack.c.bf16 %v719_v19, %v718_v18  ;;  %v590_v31 = vld [vmem:[#allocation2 + $0x8] sm:$0xff]  ;;  %vm3448_vm11 = vmpackc.low %vm831_vm10, %vm831_vm10 }
  0xb7   : > { %vm573_vm1 = vcmp.eq.s32.totalorder %v565_v2, %v2322_v5  ;;  %2705 = vmatprep.subr.bf16.mxu0 %v3093_v1  ;;  %v2713_v26 = vpack.c.bf16 %v721_v25, %v720_v24  ;;  %v589_v27 = vld [vmem:[#allocation2] sm:$0xff]  ;;  %v591_v35 = vld [vmem:[#allocation2 + $0x10] sm:$0xf]  ;;  %v2331_v41 = vld [vmem:[#allocation4] ss:$0 sm:$0xff]  ;;  %vm927_vm13 = vcmask 162816  }
  0xb8   : > { %vm574_vm2 = vcmp.eq.s32.totalorder %v566_v4, %v2322_v5  ;;  %v2323_v9 = vsel %vm573_vm1, 1.0, %v3095_v3  ;;  %vm575_vm4 = vcmp.eq.s32.totalorder %v567_v8, %v2322_v5  ;;  %vm576_vm7 = vcmp.eq.s32.totalorder %v568_v14, %v2322_v5  ;;  %2711 = vmatpush3.bf16.msra.mxu1 %v2710_v20  ;;  %s2766_s24 = smul.u32 48, %s3759_s16  ;;  %s3755_s21 = sld [smem:[#allocation19_spill]] }
  0xb9   : > { %592 = vxpose.xlu0.b32.start [1/4] (short) (narrow) %v2323_v9, 24  ;;  %v2324_v13 = vsel %vm574_vm2, 1.0, %v3095_v3  ;;  %v2325_v16 = vsel %vm575_vm4, 1.0, %v3095_v3  ;;  %v2326_v17 = vsel %vm576_vm7, 1.0, %v3095_v3  ;;  %2712 = vmatprep.subr.bf16.mxu1 %v3093_v1  ;;  %vm934_vm14 = vcmask 158720   ;;  %s2765_s19 = smul.u32 24, %s3759_s16 }
  0xba   : > { %2708 = vmatpush3.bf16.msk.msra.mxu0 %vm2707_vm6, %v2706_v15  ;;  %s3486_s27 = scalar_lea.vmem %s3722_s14, %s2766_s24  ;;  %vm2114_vm15 = vcmask 23552   ;;  %s3756_s29 = sld [smem:[#allocation20_spill]] }
  0xbb   : > { %2715 = vmatprep.subr.bf16.mxu0 %v3093_v1 }
  0xbc   : > { %2714 = vmatpush3.bf16.msra.mxu1 %v2713_v26 }
  0xbd   : > { %593 = vxpose.xlu0.b32.cont [2/4] (short) (narrow) %v2324_v13, 24  ;;  %2719 = vmatprep.subr.bf16.mxu1 %v3093_v1 }
  0xc1   : > { %594 = vxpose.xlu0.b32.cont [3/4] (short) (narrow) %v2325_v16, 24 }
  0xc5   : > { %595 = vxpose.xlu0.b32.end [4/4] (short) (narrow) %v2326_v17, 24 }
 0x139   : > { %v608_v21 = vpop.trf.xlu0 }
 0x13a   : > { %2497 = vmatmul.mubr.msk.f32.vlgmr.msra.gmra.mrb[0].mxu0 %vm624_vm8, %v608_v21  ;;  %v1059_v21 = vld [vmem:[%s3713_s5] sm:$0xff] }
 0x13b   : > { %2499 = vmatprep.mubr.msk.f32.mxu0 %vm3094_vm0, %v3095_v3 }
 0x13d   : > { %v609_v22 = vpop.trf.xlu0 }
 0x13e   : > { %2500 = vmatmul.mubr.msk.f32.gmra.mrb[2].mxu0 %vm624_vm8, %v609_v22  ;;  %v1060_v22 = vld [vmem:[%s3713_s5 + $0x8] sm:$0xff] }
 0x13f   : > { %2502 = vmatprep.mubr.msk.f32.mxu0 %vm3094_vm0, %v3095_v3 }
 0x141   : > { %v610_v23 = vpop.trf.xlu0 }
 0x142   : > { %2503 = vmatmul.mubr.msk.f32.gmra.mrb[4].mxu0 %vm624_vm8, %v610_v23  ;;  %v2723_v23 = vpack.c.bf16 %v1060_v22, %v1059_v21 }
 0x143   : > { %2528 = vmatprep.mubr.msk.f32.mxu0 %vm3094_vm0, %v3095_v3 }
 0x20d   : > { %v704_v28 = vpop.f32.mrb[0].mxu0 }
 0x20e   : > { %v3426_v29 = vadd.f32 %v704_v28, %v589_v27  ;;  %v2498_v30 = vpop.f32.mrb[1].mxu0 }
 0x210   : > { %2514 = vmatmul.mubr.msk.f32.vlgmr.msra.gmra.mrb[0].mxu1 %vm729_vm9, %v3426_v29 }
 0x211   : > { %v709_v32 = vpop.f32.mrb[2].mxu0  ;;  %2516 = vmatprep.mubr.msk.f32.mxu1 %vm3094_vm0, %v3095_v3 }
 0x212   : > { %v3432_v33 = vadd.f32 %v709_v32, %v590_v31  ;;  %v2501_v34 = vpop.f32.mrb[3].mxu0 }
 0x214   : > { %2517 = vmatmul.mubr.msk.f32.gmra.mrb[2].mxu1 %vm729_vm9, %v3432_v33 }
 0x215   : > { %v714_v36 = vpop.f32.mrb[4].mxu0  ;;  %2519 = vmatprep.mubr.msk.f32.mxu1 %vm3094_vm0, %v3095_v3 }
 0x216   : > { %v3438_v37 = vadd.f32 %v714_v36, %v591_v35  ;;  %v2504_v38 = vpop.f32.mrb[5].mxu0  ;;  %v1160_v35 = vld [vmem:[%s3715_s7] sm:$0xff]  ;;  %v1161_v36 = vld [vmem:[%s3715_s7 + $0x8] sm:$0xff] }
 0x217   : > { %v2726_v38 = vpack.c.bf16 %v1161_v36, %v1160_v35  ;;  %v2361_v36 = vld [vmem:[#allocation4 + $0x1] ss:$0 sm:$0xff] }
 0x218   : > { %2520 = vmatmul.mubr.msk.f32.gmra.mrb[4].mxu1 %vm729_vm9, %v3438_v37 }
 0x219   : > { %2543 = vmatprep.mubr.msk.f32.mxu1 %vm3094_vm0, %v3095_v3 }
 0x2e3   : > { %v805_v39 = vpop.f32.mrb[0].mxu1 }
 0x2e4   : > { %v2515_v40 = vpop.f32.mrb[1].mxu1  ;;  %v806_v43 = vadd.f32 %v2331_v41, %v805_v39 }
 0x2e6   : > { %v819_v56 = vmul.f32 0.25, %v806_v43 }
 0x2e7   : > { %v810_v42 = vpop.f32.mrb[2].mxu1 }
 0x2e8   : > { %v811_v44 = vadd.f32 %v2331_v41, %v810_v42  ;;  %v2518_v45 = vpop.f32.mrb[3].mxu1 }
 0x2e9   : > { %v1162_v45 = vld [vmem:[%s3715_s7 + $0x10] sm:$0xff] }
 0x2ea   : > { %v2845_v46 = vpack.i.bf16 %v811_v44, %v806_v43  ;;  %v820_v57 = vmul.f32 0.25, %v811_v44 }
 0x2eb   : > { %v815_v47 = vpop.f32.mrb[4].mxu1 }
 0x2ec   : > { %2846 = vrot.lane.b32.xlu1 %v2845_v46, %s3097_s17  ;;  %v816_v48 = vadd.f32 %v2331_v41, %v815_v47  ;;  %v2521_v49 = vpop.f32.mrb[5].mxu1  ;;  %v1163_v46 = vld [vmem:[%s3715_s7 + $0x18] sm:$0xff] }
 0x2ed   : > { %v2729_v47 = vpack.c.bf16 %v1163_v46, %v1162_v45  ;;  %v1264_v49 = vld [vmem:[#allocation9 + $0x8] sm:$0xff] }
 0x2ee   : > { %v821_v58 = vmul.f32 0.25, %v816_v48 }
 0x2f0   : > { %829 = vrot.lane.b32.xlu1 %v816_v48, %s3097_s17  ;;  %v1263_v48 = vld [vmem:[#allocation9] sm:$0xff] }
 0x35e   : > { %v2847_v50 = vpop.permute.xlu1 %2846 }
 0x35f   : > { %v2849_v51 = vunpack.i.h.bf16 %v2847_v50  ;;  %v2848_v52 = vunpack.i.l.bf16 %v2847_v50  ;;  %v2732_v50 = vpack.c.bf16 %v1264_v49, %v1263_v48 }
 0x361   : > { %v2716_v54 = vpack.c.bf16 %v2849_v51, %v2848_v52  ;;  %v2345_v51 = vld [vmem:[#allocation6] ss:$0 sm:$0xff] }
 0x362   : > { %v830_v55 = vpop.permute.xlu1 %829 }
 0x363   : > { %2718 = vmatpush3.bf16.xpose.msk.msra.mxu0 %vm3448_vm11, %v2716_v54  ;;  %2721 = vmatpush3.bf16.msra.mxu1 %v2716_v54 }
 0x364   : > { %2526 = vmatprep.subr.mxu0 %v3095_v3  ;;  %2541 = vmatprep.subr.mxu1 %v3095_v3 }
 0x367   : > { %2542 = vmatpush3.msk.msra.mxu1 %vm976_vm12, %v830_v55 }
 0x368   : > { %2725 = vmatprep.subr.bf16.mxu1 %v3093_v1 }
 0x36b   : > { %2527 = vmatpush3.xpose.msk.msra.mxu0 %vm831_vm10, %v830_v55 }
 0x36c   : > { %2722 = vmatprep.subr.bf16.mxu0 %v3093_v1 }
 0x36e   : > { %2529 = vmatmul.mubr.msk.f32.vlgmr.msra.gmra.mrb[6].mxu0 %vm831_vm10, %v819_v56 }
 0x36f   : > { %2531 = vmatprep.mubr.msk.f32.mxu0 %vm3094_vm0, %v3095_v3  ;;  %2724 = vmatpush3.bf16.msra.mxu0 %v2723_v23 }
 0x370   : > { %2731 = vmatprep.subr.bf16.mxu0 %v3093_v1 }
 0x372   : > { %2532 = vmatmul.mubr.msk.f32.gmra.mrb[8].mxu0 %vm831_vm10, %v820_v57 }
 0x373   : > { %2534 = vmatprep.mubr.msk.f32.mxu0 %vm3094_vm0, %v3095_v3 }
 0x376   : > { %2535 = vmatmul.mubr.msk.f32.gmra.mrb[10].mxu0 %vm831_vm10, %v821_v58 }
 0x377   : > { %2556 = vmatprep.mubr.msk.f32.mxu0 %vm3094_vm0, %v3095_v3 }
 0x441   : > { %v913_v59 = vpop.f32.mrb[6].mxu0 }
 0x442   : > { %v2530_v60 = vpop.f32.mrb[7].mxu0  ;;  %v928_v61 = vsel %vm927_vm13, %v913_v59, -inf }
 0x443   : > { %929 = vmax.xlane.f32.xlu1 %v928_v61 }
 0x445   : > { %v918_v62 = vpop.f32.mrb[8].mxu0 }
 0x446   : > { %v2533_v63 = vpop.f32.mrb[9].mxu0  ;;  %v931_v0 = vsel %vm927_vm13, %v918_v62, -inf }
 0x447   : > { %932 = vmax.xlane.f32.xlu0 %v931_v0  ;;  %v2357_v0 = vld [vmem:[%s3711_s3 + $0x20] sm:$0xff] }
 0x449   : > { %v923_v2 = vpop.f32.mrb[10].mxu0 }
 0x44a   : > { %v2536_v4 = vpop.f32.mrb[11].mxu0  ;;  %v935_v5 = vsel %vm934_vm14, %v923_v2, -inf }
 0x44b   : > { %936 = vmax.xlane.f32.xlu1 %v935_v5  ;;  %v2349_v4 = vld [vmem:[#allocation7] ss:$0 sm:$0xff] }
 0x4d0   : > { %v930_v6 = vpop.xlane.xlu1 %929 }
 0x4d1   : > { %v938_v7 = vsub.f32 %v913_v59, %v930_v6 }
 0x4d3   : > { %v941_v8 = vmul.f32 1.442695, %v938_v7 }
 0x4d4   : > { %v933_v9 = vpop.xlane.xlu0 %932 }
 0x4d5   : > { %2855 = vpow2.f32 %v941_v8  ;;  %v939_v10 = vsub.f32 %v918_v62, %v933_v9 }
 0x4d7   : > { %v943_v11 = vmul.f32 1.442695, %v939_v10 }
 0x4d8   : > { %v937_v12 = vpop.xlane.xlu1 %936 }
 0x4d9   : > { %2857 = vpow2.f32 %v943_v11  ;;  %v940_v13 = vsub.f32 %v923_v2, %v937_v12 }
 0x4db   : > { %v945_v14 = vmul.f32 1.442695, %v940_v13 }
 0x4dd   : > { %2859 = vpow2.f32 %v945_v14 }
 0x4df   : > { %v2856_v15 = vpop.eup %2855 }
 0x4e0   : > { %v947_v16 = vsel %vm927_vm13, %v2856_v15, 0.0 }
 0x4e1   : > { %948 = vadd.xlane.f32.xlu1 %v947_v16  ;;  %v2359_v16 = vld [vmem:[%s3711_s3 + $0x30] sm:$0xff] }
 0x4e3   : > { %v2858_v17 = vpop.eup %2857 }
 0x4e4   : > { %v950_v18 = vsel %vm927_vm13, %v2858_v17, 0.0 }
 0x4e5   : > { %951 = vadd.xlane.f32.xlu1 %v950_v18 }
 0x4e7   : > { %v2860_v19 = vpop.eup %2859 }
 0x4e8   : > { %v953_v20 = vsel %vm934_vm14, %v2860_v19, 0.0 }
 0x4e9   : > { %954 = vadd.xlane.f32.xlu1 %v953_v20 }
 0x56e   : > { %v949_v24 = vpop.xlane.xlu1 %948 }
 0x56f   : > { %2861 = vrcp.f32 %v949_v24 }
 0x572   : > { %v952_v25 = vpop.xlane.xlu1 %951 }
 0x573   : > { %2863 = vrcp.f32 %v952_v25 }
 0x576   : > { %v955_v26 = vpop.xlane.xlu1 %954 }
 0x577   : > { %2865 = vrcp.f32 %v955_v26 }
 0x579   : > { %v2862_v27 = vpop.eup %2861 }
 0x57a   : > { %v957_v28 = vmul.f32 %v2862_v27, %v2856_v15 }
 0x57c   : > { %962 = vst.msk [vmem:[%s3486_s27] sm:$0xff] %vm927_vm13, %v957_v28  ;;  %2544 = vmatmul.mubr.msk.f32.vlgmr.msra.gmra.mrb[6].mxu1 %vm927_vm13, %v957_v28 }
 0x57d   : > { %v2864_v30 = vpop.eup %2863  ;;  %2546 = vmatprep.mubr.msk.f32.mxu1 %vm3094_vm0, %v3095_v3  ;;  %2727 = vmatpush3.bf16.msra.mxu1 %v2726_v38 }
 0x57e   : > { %v959_v31 = vmul.f32 %v2864_v30, %v2858_v17  ;;  %2728 = vmatprep.subr.bf16.mxu1 %v3093_v1  ;;  %v2360_v17 = vld [vmem:[%s3711_s3 + $0x38] sm:$0xff] }
 0x57f   : > { %v2738_v18 = vpack.c.bf16 %v2360_v17, %v2359_v16 }
 0x580   : > { %963 = vst.msk [vmem:[%s3486_s27 + $0x8] sm:$0xff] %vm927_vm13, %v959_v31  ;;  %2547 = vmatmul.mubr.msk.f32.gmra.mrb[8].mxu1 %vm927_vm13, %v959_v31 }
 0x581   : > { %v2866_v32 = vpop.eup %2865  ;;  %2549 = vmatprep.mubr.msk.f32.mxu1 %vm3094_vm0, %v3095_v3  ;;  %2730 = vmatpush3.bf16.msra.mxu1 %v2729_v47 }
 0x582   : > { %v961_v34 = vmul.f32 %v2866_v32, %v2860_v19  ;;  %2734 = vmatprep.subr.bf16.mxu1 %v3093_v1  ;;  %v2353_v19 = vld [vmem:[#allocation10] ss:$0 sm:$0xff] }
 0x584   : > { %964 = vst.msk [vmem:[%s3486_s27 + $0x10] sm:$0xf] %vm934_vm14, %v961_v34  ;;  %2550 = vmatmul.mubr.msk.f32.gmra.mrb[10].mxu1 %vm927_vm13, %v961_v34 }
 0x585   : > { %2573 = vmatprep.mubr.msk.f32.mxu1 %vm3094_vm0, %v3095_v3 }
 0x64f   : > { %v1045_v39 = vpop.f32.mrb[6].mxu1 }
 0x650   : > { %v2545_v40 = vpop.f32.mrb[7].mxu1  ;;  %2557 = vmatmul.mubr.msk.f32.vlgmr.msra.gmra.mrb[12].mxu0 %vm831_vm10, %v1045_v39 }
 0x651   : > { %2559 = vmatprep.mubr.msk.f32.mxu0 %vm3094_vm0, %v3095_v3  ;;  %2733 = vmatpush3.bf16.msra.mxu0 %v2732_v50 }
 0x652   : > { %2740 = vmatprep.subr.bf16.mxu0 %v3093_v1 }
 0x653   : > { %v1050_v41 = vpop.f32.mrb[8].mxu1 }
 0x654   : > { %v2548_v42 = vpop.f32.mrb[9].mxu1  ;;  %2560 = vmatmul.mubr.msk.f32.gmra.mrb[14].mxu0 %vm831_vm10, %v1050_v41 }
 0x655   : > { %2562 = vmatprep.mubr.msk.f32.mxu0 %vm3094_vm0, %v3095_v3 }
 0x657   : > { %v1055_v43 = vpop.f32.mrb[10].mxu1 }
 0x658   : > { %v2551_v44 = vpop.f32.mrb[11].mxu1  ;;  %2563 = vmatmul.mubr.msk.f32.gmra.mrb[16].mxu0 %vm831_vm10, %v1055_v43 }
 0x659   : > { %2586 = vmatprep.mubr.msk.f32.mxu0 %vm3094_vm0, %v3095_v3 }
 0x723   : > { %v1143_v52 = vpop.f32.mrb[12].mxu0 }
 0x724   : > { %v1144_v54 = vadd.f32 %v2345_v51, %v1143_v52  ;;  %v2558_v55 = vpop.f32.mrb[13].mxu0 }
 0x726   : > { %v1157_v56 = vadd.f32 %v1144_v54, %v3426_v29 }
 0x727   : > { %v1148_v57 = vpop.f32.mrb[14].mxu0 }
 0x728   : > { %v1149_v58 = vadd.f32 %v2345_v51, %v1148_v57  ;;  %v2561_v59 = vpop.f32.mrb[15].mxu0  ;;  %2574 = vmatmul.mubr.msk.f32.vlgmr.msra.gmra.mrb[12].mxu1 %vm729_vm9, %v1157_v56 }
 0x729   : > { %2576 = vmatprep.mubr.msk.f32.mxu1 %vm3094_vm0, %v3095_v3 }
 0x72a   : > { %v1158_v60 = vadd.f32 %v1149_v58, %v3432_v33  ;;  %v2358_v33 = vld [vmem:[%s3711_s3 + $0x28] sm:$0xff] }
 0x72b   : > { %v1153_v61 = vpop.f32.mrb[16].mxu0  ;;  %v2735_v2 = vpack.c.bf16 %v2358_v33, %v2357_v0 }
 0x72c   : > { %v1154_v62 = vadd.f32 %v2345_v51, %v1153_v61  ;;  %v2564_v63 = vpop.f32.mrb[17].mxu0  ;;  %2577 = vmatmul.mubr.msk.f32.gmra.mrb[14].mxu1 %vm729_vm9, %v1158_v60 }
 0x72d   : > { %2579 = vmatprep.mubr.msk.f32.mxu1 %vm3094_vm0, %v3095_v3  ;;  %2736 = vmatpush3.bf16.msra.mxu1 %v2735_v2 }
 0x72e   : > { %v1159_v29 = vadd.f32 %v1154_v62, %v3438_v37  ;;  %2737 = vmatprep.subr.bf16.mxu1 %v3093_v1 }
 0x730   : > { %2580 = vmatmul.mubr.msk.f32.gmra.mrb[16].mxu1 %vm729_vm9, %v1159_v29 }
 0x731   : > { %2603 = vmatprep.mubr.msk.f32.mxu1 %vm3094_vm0, %v3095_v3  ;;  %2739 = vmatpush3.bf16.msra.mxu1 %v2738_v18 }
 0x732   : > { %2744 = vmatprep.subr.bf16.mxu1 %v3093_v1 }
 0x7fb   : > { %v1246_v5 = vpop.f32.mrb[12].mxu1 }
 0x7fc   : > { %v1247_v37 = vadd.f32 %v2349_v4, %v1246_v5  ;;  %v2575_v6 = vpop.f32.mrb[13].mxu1 }
 0x7fe   : > { %v1260_v7 = vmax.f32 %v1247_v37, 0.0 }
 0x7ff   : > { %v1251_v8 = vpop.f32.mrb[14].mxu1 }
 0x800   : > { %v1252_v9 = vadd.f32 %v2349_v4, %v1251_v8  ;;  %v2578_v10 = vpop.f32.mrb[15].mxu1  ;;  %2587 = vmatmul.mubr.msk.f32.vlgmr.msra.gmra.mrb[18].mxu0 %vm831_vm10, %v1260_v7 }
 0x801   : > { %2589 = vmatprep.mubr.msk.f32.mxu0 %vm3094_vm0, %v3095_v3 }
 0x802   : > { %v1261_v11 = vmax.f32 %v1252_v9, 0.0 }
 0x803   : > { %v1256_v12 = vpop.f32.mrb[16].mxu1 }
 0x804   : > { %v1257_v13 = vadd.f32 %v2349_v4, %v1256_v12  ;;  %v2581_v14 = vpop.f32.mrb[17].mxu1  ;;  %2590 = vmatmul.mubr.msk.f32.gmra.mrb[20].mxu0 %vm831_vm10, %v1261_v11 }
 0x805   : > { %2592 = vmatprep.mubr.msk.f32.mxu0 %vm3094_vm0, %v3095_v3  ;;  %v2379_v14 = vld [vmem:[%s3713_s5 + $0x18] sm:$0xff] }
 0x806   : > { %v1262_v15 = vmax.f32 %v1257_v13, 0.0  ;;  %v2378_v13 = vld [vmem:[%s3713_s5 + $0x10] sm:$0xff] }
 0x808   : > { %2593 = vmatmul.mubr.msk.f32.gmra.mrb[22].mxu0 %vm831_vm10, %v1262_v15  ;;  %v2748_v15 = vpack.c.bf16 %v2379_v14, %v2378_v13 }
 0x809   : > { %2618 = vmatprep.mubr.msk.f32.mxu0 %vm3094_vm0, %v3095_v3 }
 0x8d3   : > { %v1347_v20 = vpop.f32.mrb[18].mxu0 }
 0x8d4   : > { %v1348_v21 = vadd.f32 %v2353_v19, %v1347_v20  ;;  %v2588_v22 = vpop.f32.mrb[19].mxu0 }
 0x8d6   : > { %v3562_v23 = vadd.f32 %v1348_v21, %v1157_v56 }
 0x8d7   : > { %v1352_v24 = vpop.f32.mrb[20].mxu0 }
 0x8d8   : > { %v1353_v25 = vadd.f32 %v2353_v19, %v1352_v24  ;;  %v2591_v26 = vpop.f32.mrb[21].mxu0  ;;  %2604 = vmatmul.mubr.msk.f32.vlgmr.msra.gmra.mrb[18].mxu1 %vm729_vm9, %v3562_v23 }
 0x8d9   : > { %2606 = vmatprep.mubr.msk.f32.mxu1 %vm3094_vm0, %v3095_v3  ;;  %v2384_v26 = vld [vmem:[%s3715_s7 + $0x20] sm:$0xff] }
 0x8da   : > { %v3568_v27 = vadd.f32 %v1353_v25, %v1158_v60 }
 0x8db   : > { %v1357_v28 = vpop.f32.mrb[22].mxu0 }
 0x8dc   : > { %v1358_v30 = vadd.f32 %v2353_v19, %v1357_v28  ;;  %v2594_v31 = vpop.f32.mrb[23].mxu0  ;;  %2607 = vmatmul.mubr.msk.f32.gmra.mrb[20].mxu1 %vm729_vm9, %v3568_v27  ;;  %v2385_v28 = vld [vmem:[%s3715_s7 + $0x28] sm:$0xff] }
 0x8dd   : > { %2609 = vmatprep.mubr.msk.f32.mxu1 %vm3094_vm0, %v3095_v3 }
 0x8de   : > { %v3574_v32 = vadd.f32 %v1358_v30, %v1159_v29  ;;  %v2751_v30 = vpack.c.bf16 %v2385_v28, %v2384_v26 }
 0x8e0   : > { %2610 = vmatmul.mubr.msk.f32.gmra.mrb[22].mxu1 %vm729_vm9, %v3574_v32 }
 0x8e1   : > { %2633 = vmatprep.mubr.msk.f32.mxu1 %vm3094_vm0, %v3095_v3 }
 0x9ab   : > { %v1452_v34 = vpop.f32.mrb[18].mxu1 }
 0x9ac   : > { %v2605_v35 = vpop.f32.mrb[19].mxu1  ;;  %v1453_v39 = vadd.f32 %v2361_v36, %v1452_v34 }
 0x9ae   : > { %v1466_v51 = vmul.f32 0.25, %v1453_v39 }
 0x9af   : > { %v1457_v38 = vpop.f32.mrb[20].mxu1 }
 0x9b0   : > { %v1458_v40 = vadd.f32 %v2361_v36, %v1457_v38  ;;  %v2608_v41 = vpop.f32.mrb[21].mxu1 }
 0x9b1   : > { %v2387_v41 = vld [vmem:[%s3715_s7 + $0x38] sm:$0xff] }
 0x9b2   : > { %v2850_v42 = vpack.i.bf16 %v1458_v40, %v1453_v39  ;;  %v1467_v53 = vmul.f32 0.25, %v1458_v40  ;;  %v2386_v40 = vld [vmem:[%s3715_s7 + $0x30] sm:$0xff] }
 0x9b3   : > { %v1462_v43 = vpop.f32.mrb[22].mxu1 }
 0x9b4   : > { %v1463_v44 = vadd.f32 %v2361_v36, %v1462_v43  ;;  %2851 = vrot.lane.b32.xlu1 %v2850_v42, %s3097_s17  ;;  %v2611_v45 = vpop.f32.mrb[23].mxu1  ;;  %v2754_v42 = vpack.c.bf16 %v2387_v41, %v2386_v40  ;;  %v1912_v43 = vld [vmem:[#allocation9 + $0x10] sm:$0xff] }
 0x9b6   : > { %1476 = vrot.lane.b32.xlu0 %v1463_v44, %s3097_s17  ;;  %v1468_v52 = vmul.f32 0.25, %v1463_v44  ;;  %v1913_v44 = vld [vmem:[#allocation9 + $0x18] sm:$0xff] }
 0x9b7   : > { %v2757_v45 = vpack.c.bf16 %v1913_v44, %v1912_v43 }
 0xa26   : > { %v2852_v46 = vpop.permute.xlu1 %2851 }
 0xa27   : > { %v2854_v47 = vunpack.i.h.bf16 %v2852_v46  ;;  %v2853_v48 = vunpack.i.l.bf16 %v2852_v46  ;;  %v2380_v46 = vld [vmem:[#allocation6 + $0x1] ss:$0 sm:$0xff] }
 0xa28   : > { %v1477_v50 = vpop.permute.xlu0 %1476 }
 0xa29   : > { %v2741_v49 = vpack.c.bf16 %v2854_v47, %v2853_v48 }
 0xa2b   : > { %2743 = vmatpush3.bf16.xpose.msk.msra.mxu0 %vm3448_vm11, %v2741_v49  ;;  %2746 = vmatpush3.bf16.msra.mxu1 %v2741_v49 }
 0xa2c   : > { %2631 = vmatprep.subr.mxu1 %v3095_v3  ;;  %2616 = vmatprep.subr.mxu0 %v3095_v3 }
 0xa2f   : > { %2632 = vmatpush3.msk.msra.mxu1 %vm976_vm12, %v1477_v50 }
 0xa30   : > { %2750 = vmatprep.subr.bf16.mxu1 %v3093_v1 }
 0xa33   : > { %2617 = vmatpush3.xpose.msk.msra.mxu0 %vm831_vm10, %v1477_v50 }
 0xa34   : > { %2747 = vmatprep.subr.bf16.mxu0 %v3093_v1 }
 0xa36   : > { %2619 = vmatmul.mubr.msk.f32.vlgmr.msra.gmra.mrb[24].mxu0 %vm831_vm10, %v1466_v51 }
 0xa37   : > { %2621 = vmatprep.mubr.msk.f32.mxu0 %vm3094_vm0, %v3095_v3  ;;  %2749 = vmatpush3.bf16.msra.mxu0 %v2748_v15 }
 0xa38   : > { %2756 = vmatprep.subr.bf16.mxu0 %v3093_v1 }
 0xa3a   : > { %2622 = vmatmul.mubr.msk.f32.gmra.mrb[26].mxu0 %vm831_vm10, %v1467_v53 }
 0xa3b   : > { %2624 = vmatprep.mubr.msk.f32.mxu0 %vm3094_vm0, %v3095_v3 }
 0xa3e   : > { %2625 = vmatmul.mubr.msk.f32.gmra.mrb[28].mxu0 %vm831_vm10, %v1468_v52 }
 0xa3f   : > { %2646 = vmatprep.mubr.msk.f32.mxu0 %vm3094_vm0, %v3095_v3 }
 0xb09   : > { %v1559_v54 = vpop.f32.mrb[24].mxu0 }
 0xb0a   : > { %v2620_v55 = vpop.f32.mrb[25].mxu0  ;;  %v1573_v56 = vsel %vm927_vm13, %v1559_v54, -inf }
 0xb0b   : > { %1574 = vmax.xlane.f32.xlu1 %v1573_v56 }
 0xb0d   : > { %v1564_v57 = vpop.f32.mrb[26].mxu0 }
 0xb0e   : > { %v2623_v58 = vpop.f32.mrb[27].mxu0  ;;  %v1576_v59 = vsel %vm927_vm13, %v1564_v57, -inf }
 0xb0f   : > { %1577 = vmax.xlane.f32.xlu0 %v1576_v59  ;;  %v2014_v58 = vld [vmem:[%s3719_s11] sm:$0xff] }
 0xb11   : > { %v1569_v60 = vpop.f32.mrb[28].mxu0 }
 0xb12   : > { %v2626_v61 = vpop.f32.mrb[29].mxu0  ;;  %v1579_v62 = vsel %vm934_vm14, %v1569_v60, -inf }
 0xb13   : > { %1580 = vmax.xlane.f32.xlu1 %v1579_v62 }
 0xb98   : > { %v1575_v63 = vpop.xlane.xlu1 %1574 }
 0xb99   : > { %v1582_v29 = vsub.f32 %v1559_v54, %v1575_v63 }
 0xb9b   : > { %v1585_v0 = vmul.f32 1.442695, %v1582_v29 }
 0xb9c   : > { %v1578_v33 = vpop.xlane.xlu0 %1577 }
 0xb9d   : > { %2867 = vpow2.f32 %v1585_v0  ;;  %v1583_v2 = vsub.f32 %v1564_v57, %v1578_v33 }
 0xb9f   : > { %v1587_v4 = vmul.f32 1.442695, %v1583_v2 }
 0xba0   : > { %v1581_v5 = vpop.xlane.xlu1 %1580 }
 0xba1   : > { %2869 = vpow2.f32 %v1587_v4  ;;  %v1584_v37 = vsub.f32 %v1569_v60, %v1581_v5  ;;  %v2388_v60 = vld [vmem:[#allocation7 + $0x1] ss:$0 sm:$0xff] }
 0xba3   : > { %v1589_v6 = vmul.f32 1.442695, %v1584_v37 }
 0xba5   : > { %2871 = vpow2.f32 %v1589_v6  ;;  %v2016_v6 = vld [vmem:[%s3719_s11 + $0x10] sm:$0xff] }
 0xba7   : > { %v2868_v7 = vpop.eup %2867 }
 0xba8   : > { %v1591_v8 = vsel %vm927_vm13, %v2868_v7, 0.0 }
 0xba9   : > { %1592 = vadd.xlane.f32.xlu0 %v1591_v8 }
 0xbab   : > { %v2870_v9 = vpop.eup %2869 }
 0xbac   : > { %v1594_v10 = vsel %vm927_vm13, %v2870_v9, 0.0 }
 0xbad   : > { %1595 = vadd.xlane.f32.xlu1 %v1594_v10 }
 0xbaf   : > { %v2872_v11 = vpop.eup %2871 }
 0xbb0   : > { %v1597_v12 = vsel %vm934_vm14, %v2872_v11, 0.0 }
 0xbb1   : > { %1598 = vadd.xlane.f32.xlu0 %v1597_v12 }
 0xc36   : > { %v1593_v16 = vpop.xlane.xlu0 %1592 }
 0xc37   : > { %2873 = vrcp.f32 %v1593_v16 }
 0xc3a   : > { %v1596_v17 = vpop.xlane.xlu1 %1595 }
 0xc3b   : > { %2875 = vrcp.f32 %v1596_v17 }
 0xc3e   : > { %v1599_v18 = vpop.xlane.xlu0 %1598 }
 0xc3f   : > { %2877 = vrcp.f32 %v1599_v18 }
 0xc41   : > { %v2874_v19 = vpop.eup %2873 }
 0xc42   : > { %v1601_v20 = vmul.f32 %v2874_v19, %v2868_v7  ;;  %v2017_v7 = vld [vmem:[%s3719_s11 + $0x18] sm:$0xff] }
 0xc43   : > { %v2763_v8 = vpack.c.bf16 %v2017_v7, %v2016_v6 }
 0xc44   : > { %2371 = vst.msk [vmem:[%s3486_s27 + $0x18] sm:$0xff] %vm927_vm13, %v1601_v20  ;;  %2634 = vmatmul.mubr.msk.f32.vlgmr.msra.gmra.mrb[24].mxu1 %vm927_vm13, %v1601_v20 }
 0xc45   : > { %v2876_v21 = vpop.eup %2875  ;;  %2636 = vmatprep.mubr.msk.f32.mxu1 %vm3094_vm0, %v3095_v3  ;;  %2752 = vmatpush3.bf16.msra.mxu1 %v2751_v30 }
 0xc46   : > { %v1603_v22 = vmul.f32 %v2876_v21, %v2870_v9  ;;  %2753 = vmatprep.subr.bf16.mxu1 %v3093_v1  ;;  %v2392_v9 = vld [vmem:[#allocation10 + $0x1] ss:$0 sm:$0xff] }
 0xc48   : > { %2372 = vst.msk [vmem:[%s3486_s27 + $0x20] sm:$0xff] %vm927_vm13, %v1603_v22  ;;  %2637 = vmatmul.mubr.msk.f32.gmra.mrb[26].mxu1 %vm927_vm13, %v1603_v22  ;;  %v2396_v22 = vld [vmem:[%s3755_s21] ss:$0 sm:$0xff] }
 0xc49   : > { %v2878_v24 = vpop.eup %2877  ;;  %2639 = vmatprep.mubr.msk.f32.mxu1 %vm3094_vm0, %v3095_v3  ;;  %2755 = vmatpush3.bf16.msra.mxu1 %v2754_v42 }
 0xc4a   : > { %v1605_v25 = vmul.f32 %v2878_v24, %v2872_v11  ;;  %2759 = vmatprep.subr.bf16.mxu1 %v3093_v1 }
 0xc4c   : > { %2373 = vst.msk [vmem:[%s3486_s27 + $0x28] sm:$0xf] %vm934_vm14, %v1605_v25  ;;  %2640 = vmatmul.mubr.msk.f32.gmra.mrb[28].mxu1 %vm927_vm13, %v1605_v25  ;;  %s557_s27 = scalar_lea.vmem %s3756_s29, %s2765_s19 }
 0xc4d   : > { %2663 = vmatprep.mubr.msk.f32.mxu1 %vm3094_vm0, %v3095_v3 }
 0xd17   : > { %v1689_v31 = vpop.f32.mrb[24].mxu1 }
 0xd18   : > { %v2635_v34 = vpop.f32.mrb[25].mxu1  ;;  %2647 = vmatmul.mubr.msk.f32.vlgmr.msra.gmra.mrb[30].mxu0 %vm831_vm10, %v1689_v31 }
 0xd19   : > { %2649 = vmatprep.mubr.msk.f32.mxu0 %vm3094_vm0, %v3095_v3  ;;  %2758 = vmatpush3.bf16.msra.mxu0 %v2757_v45 }
 0xd1b   : > { %v1694_v35 = vpop.f32.mrb[26].mxu1 }
 0xd1c   : > { %v2638_v36 = vpop.f32.mrb[27].mxu1  ;;  %2650 = vmatmul.mubr.msk.f32.gmra.mrb[32].mxu0 %vm831_vm10, %v1694_v35 }
 0xd1d   : > { %2652 = vmatprep.mubr.msk.f32.mxu0 %vm3094_vm0, %v3095_v3 }
 0xd1f   : > { %v1699_v38 = vpop.f32.mrb[28].mxu1 }
 0xd20   : > { %v2641_v39 = vpop.f32.mrb[29].mxu1  ;;  %2653 = vmatmul.mubr.msk.f32.gmra.mrb[34].mxu0 %vm831_vm10, %v1699_v38 }
 0xd21   : > { %2676 = vmatprep.mubr.msk.f32.mxu0 %vm3094_vm0, %v3095_v3 }
 0xdeb   : > { %v1789_v47 = vpop.f32.mrb[30].mxu0 }
 0xdec   : > { %v1790_v48 = vadd.f32 %v2380_v46, %v1789_v47  ;;  %v2648_v49 = vpop.f32.mrb[31].mxu0 }
 0xdee   : > { %v1803_v50 = vadd.f32 %v1790_v48, %v3562_v23 }
 0xdef   : > { %v1794_v51 = vpop.f32.mrb[32].mxu0 }
 0xdf0   : > { %v1795_v53 = vadd.f32 %v2380_v46, %v1794_v51  ;;  %v2651_v52 = vpop.f32.mrb[33].mxu0  ;;  %2664 = vmatmul.mubr.msk.f32.vlgmr.msra.gmra.mrb[30].mxu1 %vm729_vm9, %v1803_v50 }
 0xdf1   : > { %2666 = vmatprep.mubr.msk.f32.mxu1 %vm3094_vm0, %v3095_v3 }
 0xdf2   : > { %v1804_v54 = vadd.f32 %v1795_v53, %v3568_v27  ;;  %v2015_v27 = vld [vmem:[%s3719_s11 + $0x8] sm:$0xff] }
 0xdf3   : > { %v1799_v55 = vpop.f32.mrb[34].mxu0  ;;  %v2760_v59 = vpack.c.bf16 %v2015_v27, %v2014_v58 }
 0xdf4   : > { %v1800_v56 = vadd.f32 %v2380_v46, %v1799_v55  ;;  %v2654_v57 = vpop.f32.mrb[35].mxu0  ;;  %2667 = vmatmul.mubr.msk.f32.gmra.mrb[32].mxu1 %vm729_vm9, %v1804_v54 }
 0xdf5   : > { %2669 = vmatprep.mubr.msk.f32.mxu1 %vm3094_vm0, %v3095_v3  ;;  %2761 = vmatpush3.bf16.msra.mxu1 %v2760_v59 }
 0xdf6   : > { %v1805_v23 = vadd.f32 %v1800_v56, %v3574_v32  ;;  %2762 = vmatprep.subr.bf16.mxu1 %v3093_v1 }
 0xdf8   : > { %2670 = vmatmul.mubr.msk.f32.gmra.mrb[34].mxu1 %vm729_vm9, %v1805_v23 }
 0xdf9   : > { %2693 = vmatprep.mubr.msk.f32.mxu1 %vm3094_vm0, %v3095_v3  ;;  %2764 = vmatpush3.bf16.msra.mxu1 %v2763_v8 }
 0xec3   : > { %v1894_v61 = vpop.f32.mrb[30].mxu1 }
 0xec4   : > { %v1895_v32 = vadd.f32 %v2388_v60, %v1894_v61  ;;  %v2665_v62 = vpop.f32.mrb[31].mxu1 }
 0xec6   : > { %v1908_v63 = vmax.f32 %v1895_v32, 0.0 }
 0xec7   : > { %v1899_v29 = vpop.f32.mrb[32].mxu1 }
 0xec8   : > { %v1900_v0 = vadd.f32 %v2388_v60, %v1899_v29  ;;  %v2668_v33 = vpop.f32.mrb[33].mxu1  ;;  %2677 = vmatmul.mubr.msk.f32.vlgmr.msra.gmra.mrb[36].mxu0 %vm831_vm10, %v1908_v63 }
 0xec9   : > { %2679 = vmatprep.mubr.msk.f32.mxu0 %vm3094_vm0, %v3095_v3 }
 0xeca   : > { %v1909_v2 = vmax.f32 %v1900_v0, 0.0 }
 0xecb   : > { %v1904_v4 = vpop.f32.mrb[34].mxu1 }
 0xecc   : > { %v1905_v5 = vadd.f32 %v2388_v60, %v1904_v4  ;;  %v2671_v37 = vpop.f32.mrb[35].mxu1  ;;  %2680 = vmatmul.mubr.msk.f32.gmra.mrb[38].mxu0 %vm831_vm10, %v1909_v2 }
 0xecd   : > { %2682 = vmatprep.mubr.msk.f32.mxu0 %vm3094_vm0, %v3095_v3 }
 0xece   : > { %v1910_v1 = vmax.f32 %v1905_v5, 0.0 }
 0xed0   : > { %2683 = vmatmul.mubr.msk.f32.gmra.mrb[40].mxu0 %vm831_vm10, %v1910_v1 }
 0xf9b   : > { %v1997_v10 = vpop.f32.mrb[36].mxu0 }
 0xf9c   : > { %v1998_v11 = vadd.f32 %v2392_v9, %v1997_v10  ;;  %v2678_v12 = vpop.f32.mrb[37].mxu0 }
 0xf9e   : > { %v2011_v13 = vadd.f32 %v1998_v11, %v1803_v50 }
 0xf9f   : > { %v2002_v14 = vpop.f32.mrb[38].mxu0 }
 0xfa0   : > { %v2003_v15 = vadd.f32 %v2392_v9, %v2002_v14  ;;  %v2681_v16 = vpop.f32.mrb[39].mxu0  ;;  %2694 = vmatmul.mubr.msk.f32.vlgmr.msra.gmra.mrb[36].mxu1 %vm729_vm9, %v2011_v13 }
 0xfa1   : > { %2696 = vmatprep.mubr.msk.f32.mxu1 %vm3094_vm0, %v3095_v3 }
 0xfa2   : > { %v2012_v17 = vadd.f32 %v2003_v15, %v1804_v54 }
 0xfa3   : > { %v2007_v18 = vpop.f32.mrb[40].mxu0 }
 0xfa4   : > { %v2008_v19 = vadd.f32 %v2392_v9, %v2007_v18  ;;  %v2684_v20 = vpop.f32.mrb[41].mxu0  ;;  %2697 = vmatmul.mubr.msk.f32.gmra.mrb[38].mxu1 %vm729_vm9, %v2012_v17 }
 0xfa5   : > { %2699 = vmatprep.mubr.msk.f32.mxu1 %vm3094_vm0, %v3095_v3  ;;  %vm2121_vm0 = vcmask 19456  }
 0xfa6   : > { %v2013_v21 = vadd.f32 %v2008_v19, %v1805_v23 }
 0xfa8   : > { %2700 = vmatmul.mubr.msk.f32.gmra.mrb[40].mxu1 %vm729_vm9, %v2013_v21 }
0x1073   : > { %v2100_v24 = vpop.f32.mrb[36].mxu1 }
0x1074   : > { %v2101_v25 = vadd.f32 %v2396_v22, %v2100_v24  ;;  %v2695_v26 = vpop.f32.mrb[37].mxu1 }
0x1076   : > { %v2115_v28 = vsel %vm2114_vm15, %v2101_v25, -inf }
0x1077   : > { %2116 = vmax.xlane.f32.xlu1 %v2115_v28  ;;  %v2105_v30 = vpop.f32.mrb[38].mxu1 }
0x1078   : > { %v2106_v31 = vadd.f32 %v2396_v22, %v2105_v30  ;;  %v2698_v34 = vpop.f32.mrb[39].mxu1 }
0x107a   : > { %v2118_v35 = vsel %vm2114_vm15, %v2106_v31, -inf }
0x107b   : > { %2119 = vmax.xlane.f32.xlu0 %v2118_v35  ;;  %v2110_v3 = vpop.f32.mrb[40].mxu1 }
0x107c   : > { %v2111_v36 = vadd.f32 %v2396_v22, %v2110_v3  ;;  %v2701_v38 = vpop.f32.mrb[41].mxu1 }
0x107e   : > { %v2122_v39 = vsel %vm2121_vm0, %v2111_v36, -inf }
0x107f   : > { %2123 = vmax.xlane.f32.xlu1 %v2122_v39 }
0x1104   : > { %v2117_v40 = vpop.xlane.xlu1 %2116 }
0x1105   : > { %v2125_v41 = vsub.f32 %v2101_v25, %v2117_v40 }
0x1107   : > { %v2128_v42 = vmul.f32 1.442695, %v2125_v41 }
0x1108   : > { %v2120_v43 = vpop.xlane.xlu0 %2119 }
0x1109   : > { %2879 = vpow2.f32 %v2128_v42  ;;  %v2126_v44 = vsub.f32 %v2106_v31, %v2120_v43 }
0x110b   : > { %v2130_v45 = vmul.f32 1.442695, %v2126_v44 }
0x110c   : > { %v2124_v46 = vpop.xlane.xlu1 %2123 }
0x110d   : > { %2881 = vpow2.f32 %v2130_v45  ;;  %v2127_v47 = vsub.f32 %v2111_v36, %v2124_v46 }
0x110f   : > { %v2132_v48 = vmul.f32 1.442695, %v2127_v47 }
0x1111   : > { %2883 = vpow2.f32 %v2132_v48 }
0x1113   : > { %v2880_v49 = vpop.eup %2879 }
0x1114   : > { %v2134_v50 = vsel %vm2114_vm15, %v2880_v49, 0.0 }
0x1115   : > { %2135 = vadd.xlane.f32.xlu0 %v2134_v50 }
0x1117   : > { %v2882_v51 = vpop.eup %2881 }
0x1118   : > { %v2137_v53 = vsel %vm2114_vm15, %v2882_v51, 0.0 }
0x1119   : > { %2138 = vadd.xlane.f32.xlu1 %v2137_v53 }
0x111b   : > { %v2884_v52 = vpop.eup %2883 }
0x111c   : > { %v2140_v54 = vsel %vm2121_vm0, %v2884_v52, 0.0 }
0x111d   : > { %2141 = vadd.xlane.f32.xlu0 %v2140_v54 }
0x11a2   : > { %v2136_v55 = vpop.xlane.xlu0 %2135 }
0x11a3   : > { %2885 = vlog2.f32 %v2136_v55 }
0x11a6   : > { %v2139_v56 = vpop.xlane.xlu1 %2138 }
0x11a7   : > { %2887 = vlog2.f32 %v2139_v56 }
0x11aa   : > { %v2142_v57 = vpop.xlane.xlu0 %2141 }
0x11ab   : > { %2889 = vlog2.f32 %v2142_v57 }
0x11ad   : > { %v2886_v23 = vpop.eup %2885 }
0x11ae   : > { %v2144_v58 = vmul.f32 0.6931472, %v2886_v23 }
0x11b0   : > { %v2149_v27 = vadd.f32 %v2144_v58, %v2117_v40 }
0x11b1   : > { %v2888_v59 = vpop.eup %2887 }
0x11b2   : > { %v2152_v60 = vsub.f32 %v2101_v25, %v2149_v27  ;;  %v2146_v61 = vmul.f32 0.6931472, %v2888_v59 }
0x11b4   : > { %2155 = vst.msk [vmem:[%s557_s27] sm:$0xff] %vm2114_vm15, %v2152_v60  ;;  %v2150_v32 = vadd.f32 %v2146_v61, %v2120_v43 }
0x11b5   : > { %v2890_v62 = vpop.eup %2889 }
0x11b6   : > { %v2153_v63 = vsub.f32 %v2106_v31, %v2150_v32  ;;  %v2148_v29 = vmul.f32 0.6931472, %v2890_v62 }
0x11b8   : > { %2156 = vst.msk [vmem:[%s557_s27 + $0x8] sm:$0xff] %vm2114_vm15, %v2153_v63  ;;  %v2151_v0 = vadd.f32 %v2148_v29, %v2124_v46 }
0x11ba   : > { %v2154_v33 = vsub.f32 %v2111_v36, %v2151_v0 }
0x11bc   : > { %2157 = vst.msk [vmem:[%s557_s27 + $0x10] sm:$0xf] %vm2121_vm0, %v2154_v33 }
0x11bd PF: > { %s3757_s16 = sld [smem:[#allocation16_spill]] }
0x11c3   : > { %s29_s29 = sadd.s32 1, %s3757_s16  }
0x11c4   : > { %p26_p9 = scmp.ge.s32.totalorder %s29_s29, 10  }
0x11c6   :  { %28 = sbr.rel (!%p26_p9) target bundleno = 9 (0x9), region = 148 }
0x11cd   :  { %2195 = vsyncpa [#allocation3], 1 }
0x11ce   :  { %2197 = vsyncpa [#allocation3 + $0x1], 1 }
0x11cf   :  { %2198 = vsyncpa [#allocation5], 1 }
0x11d0   :  { %2199 = vsyncpa [#allocation8], 1 }
0x11d1   :  { %2200 = vsyncpa [#allocation11], 1 }

</bundles_post_ra>
